<compile_context>
chip_gen: v7x
topology: tpu7x:2x2x1
jax: 0.10.0
libtpu: 0.0.40
codegen_flags: <defaults>
</compile_context>

<pallas_src>
import functools

import numpy as np
import jax
import jax.numpy as jnp
from jax.experimental import pallas as pl
from jax.experimental.pallas import tpu as pltpu

# ------------------------- configuration (WtNet defaults, small hidden) -----
LEVEL = 4
N_BLOCKS = LEVEL + 1
IN_CHN = 7
OUT_CHN = 7
HID = 128          # hid_chn (512 in the reference default; kept small here)
PRED_LEN = 96
FILTER_LEN = 8     # db4 filter length
LN_EPS = 1e-5
OC_PAD = 128       # lane-dense padding of the 7-wide output dimension
HCAT = N_BLOCKS * HID   # 640 = concatenated hidden width

# pywt Wavelet('db4') decomposition filters
DEC_LO_NP = np.array(
    [-0.010597401784997278, 0.032883011666982945, 0.030841381835986965,
     -0.18703481171888114, -0.02798376941698385, 0.6308807679295904,
     0.7148465705525415, 0.23037781330885523], np.float64)
DEC_HI_NP = np.array(
    [-0.23037781330885523, 0.7148465705525415, -0.6308807679295904,
     -0.02798376941698385, 0.18703481171888114, 0.030841381835986965,
     -0.032883011666982945, -0.010597401784997278], np.float64)
DEC_LO = jnp.asarray(DEC_LO_NP, jnp.float32)
DEC_HI = jnp.asarray(DEC_HI_NP, jnp.float32)


def wt_features(pred_len=PRED_LEN, filter_len=FILTER_LEN, level=LEVEL):
    """Replicates the feature-length bookkeeping in WtNet.__init__."""
    feature = []
    for i in range(level):
        pred_len = int((pred_len + filter_len - 1) / 2)
        feature.append(pred_len)
        if i == level - 1:
            feature.append(pred_len)
    feature.reverse()
    return feature               # [12, 12, 18, 29, 51]


# -------- exact db4 DWT matrices (offline fold path; float64 numpy) ---------
def _dwt_level_matrices(n, f=FILTER_LEN):
    """One pywt-style symmetric-mode DWT level as explicit (n, n_out) matrices.

    c_lo[k] = sum_j a[e_idx[2k+j]] * DEC_LO[::-1][j]  (same for hi); identical
    to the strided-correlation formulation used by the reference `_dwt_step`.
    """
    lo_rev = DEC_LO_NP[::-1]
    hi_rev = DEC_HI_NP[::-1]
    left = list(range(f - 1))[::-1]
    right = list(range(n - (f - 1), n))[::-1]
    e_idx = (left + list(range(n)) + right)[1:]          # length n + 2f - 3
    n_out = (n + f - 1) // 2
    m_lo = np.zeros((n, n_out), np.float64)
    m_hi = np.zeros((n, n_out), np.float64)
    for k in range(n_out):
        for j in range(f):
            src = e_idx[2 * k + j]
            m_lo[src, k] += lo_rev[j]
            m_hi[src, k] += hi_rev[j]
    return m_lo, m_hi


def build_dwt_matrices(length=PRED_LEN, level=LEVEL):
    """D matrices s.t. wavedec(rows)[i] == rows @ D[i]; order [cA_n, cD_n..cD_1]."""
    a_map = np.eye(length, dtype=np.float64)
    details = []
    for _ in range(level):
        m_lo, m_hi = _dwt_level_matrices(a_map.shape[1])
        details.append(a_map @ m_hi)
        a_map = a_map @ m_lo
    return [a_map] + details[::-1]


# -------- conv-based row DWT (reference path only; independent formulation) -
def _dwt_step(a, filt):
    """One pywt-style DWT level (mode='symmetric') along the last axis."""
    f = filt.shape[-1]
    n = a.shape[-1]
    left = a[:, :f - 1][:, ::-1]
    right = a[:, n - (f - 1):][:, ::-1]
    e = jnp.concatenate([left, a, right], axis=-1)[:, 1:]       # (R, n+2F-3)
    out = jax.lax.conv_general_dilated(
        e[:, None, :], filt, window_strides=(2,), padding='VALID',
        dimension_numbers=('NCH', 'OIH', 'NCH'),
        precision=jax.lax.Precision.HIGHEST)                    # (R, 2, n_out)
    return out[:, 0, :], out[:, 1, :]


def wavedec_rows(a, level):
    """a: (R, L) -> [cA_n, cD_n, ..., cD_1], each (R, feat_i)."""
    filt = jnp.stack([DEC_LO[::-1], DEC_HI[::-1]], axis=0)[:, None, :]
    details = []
    for _ in range(level):
        a, d = _dwt_step(a, filt)
        details.append(d)
    return [a] + details[::-1]


# ----------------------------- math helpers (kernel + reference) ------------
def _gelu(x):
    # TODO(synk): PyTorch nn.GELU default is exact-erf; tanh-approx GELU is
    # used here (|diff| <~1e-3) so the transcendental goes to the EUP slot.
    c = 0.7978845608028654  # sqrt(2/pi)
    return 0.5 * x * (1.0 + jnp.tanh(c * (x + 0.044715 * x * x * x)))


def _layernorm(h, gamma, beta):
    """Two-pass LayerNorm (reference path; mirrors torch literally)."""
    mu = jnp.mean(h, axis=-1, keepdims=True)
    var = jnp.mean((h - mu) ** 2, axis=-1, keepdims=True)
    return (h - mu) * jax.lax.rsqrt(var + LN_EPS) * gamma + beta


def _layernorm_1p(h, gamma, beta):
    """Single-pass LayerNorm (kernel path): var = E[x^2] - mu^2."""
    mu = jnp.mean(h, axis=-1, keepdims=True)
    ms = jnp.mean(h * h, axis=-1, keepdims=True)
    var = ms - mu * mu
    return (h - mu) * jax.lax.rsqrt(var + LN_EPS) * gamma + beta


# ----------------------------- Pallas kernel --------------------------------
# Inputs (all whole-array VMEM residents, no grid):
#   x_ref     (R, 96)        raw time rows (DWT already folded into w1)
#   w1_ref    (96, 640)      concat_i(D_i @ W1_i)
#   wtail_ref (768, 128)     rows [0:640) = W2cat @ fW1, rows [640:768) = fW2 (lane-padded)
#   vec_ref   (8, 640)       row 0 b1cat | 1 g1cat | 2 be1cat |
#                            3 b2f | 4 fg | 5 fbe | 6 fb2(pad) | 7 zeros (rows 3-6 use lanes [0:128))
#   out_ref   (R, 128)       lane-dense output; wrapper slices [:, :OUT_CHN]
def wtnet_kernel(x_ref, w1_ref, wtail_ref, vec_ref, out_ref):
    # Fused first Linear of all 5 levels: one K=96 matmul, bias over all lanes.
    h = jnp.dot(x_ref[...], w1_ref[...],
                preferred_element_type=jnp.float32) + vec_ref[0:1, :]   # (R, 640)
    h = _gelu(h)

    # Per-level LayerNorm on vreg-aligned 128-lane slabs (Dropout p=0).
    slabs = []
    for i in range(N_BLOCKS):
        lo = i * HID
        slabs.append(_layernorm_1p(h[:, lo:lo + HID],
                                   vec_ref[1:2, lo:lo + HID],
                                   vec_ref[2:3, lo:lo + HID]))
    h_cat = jnp.concatenate(slabs, axis=-1)                              # (R, 640)

    # Second per-level Linear + sum over levels + feature_mlp first Linear,
    # all folded into a single K=640 matmul (W2f = W2cat @ fW1, offline).
    h2 = jnp.dot(h_cat, wtail_ref[0:HCAT, :],
                 preferred_element_type=jnp.float32) + vec_ref[3:4, 0:HID]
    h2 = _gelu(h2)
    h2 = _layernorm_1p(h2, vec_ref[4:5, 0:HID], vec_ref[5:6, 0:HID])

    # feature_mlp second Linear (lane-dense, columns >= OUT_CHN are zero).
    out_ref[...] = (jnp.dot(h2, wtail_ref[HCAT:HCAT + OC_PAD, :],
                            preferred_element_type=jnp.float32)
                    + vec_ref[6:7, 0:OC_PAD]).astype(out_ref.dtype)


# ----------------------------- wrapper ---------------------------------------
@jax.jit
def wtnet_forward(x, x_time, p):
    del x_time  # unused in the reference forward as well
    b, L, c = x.shape
    r = b * c

    # rows = flattened (batch, channel) pairs along time; DWT is folded into W1.
    rows = jnp.transpose(x, (0, 2, 1)).reshape(r, L).astype(jnp.float32)

    vmem = pl.BlockSpec(memory_space=pltpu.MemorySpace.VMEM)
    out = pl.pallas_call(
        wtnet_kernel,
        out_shape=jax.ShapeDtypeStruct((r, OC_PAD), jnp.float32),
        in_specs=[vmem] * 4,
        out_specs=vmem,
    )(rows, p['W1cat'], p['Wtail'], p['vecs'])

    # rows are (b, c); slice lane padding, reshape back to torch's (B, out_chn, C).
    y_pred = jnp.transpose(out[:, :OUT_CHN].reshape(b, c, OUT_CHN), (0, 2, 1))
    return y_pred, x


# ----------------------------- parameters (deterministic) --------------------
def init_raw_params(key, feature, hid=HID, out_chn=OUT_CHN):
    """Unpadded, per-level parameters mirroring the PyTorch module layout."""
    n = len(feature)
    keys = jax.random.split(key, 4 * n + 4)
    W1, b1, g1, be1, W2, b2 = [], [], [], [], [], []
    ki = 0
    for f in feature:
        W1.append(jax.random.normal(keys[ki], (f, hid), jnp.float32) / jnp.sqrt(f)); ki += 1
        b1.append(jax.random.normal(keys[ki], (hid,), jnp.float32) * 0.01); ki += 1
        g1.append(jnp.ones((hid,), jnp.float32))
        be1.append(jnp.zeros((hid,), jnp.float32))
        W2.append(jax.random.normal(keys[ki], (hid, out_chn), jnp.float32) / jnp.sqrt(hid)); ki += 1
        b2.append(jax.random.normal(keys[ki], (out_chn,), jnp.float32) * 0.01); ki += 1
    fW1 = jax.random.normal(keys[ki], (out_chn, hid), jnp.float32) / jnp.sqrt(out_chn)
    fb1 = jax.random.normal(keys[ki + 1], (hid,), jnp.float32) * 0.01
    fW2 = jax.random.normal(keys[ki + 2], (hid, out_chn), jnp.float32) / jnp.sqrt(hid)
    fb2 = jax.random.normal(keys[ki + 3], (out_chn,), jnp.float32) * 0.01
    return dict(W1=W1, b1=b1, g1=g1, be1=be1, W2=W2, b2=b2,
                fW1=fW1, fb1=fb1, fg=jnp.ones((hid,), jnp.float32),
                fbe=jnp.zeros((hid,), jnp.float32), fW2=fW2, fb2=fb2)


def pack_params(raw):
    """Offline folds + lane-dense packing (all folds in float64 -> f32).

    Produces exactly 4 kernel inputs:
      W1cat (96, 640)  = concat_i(D_i @ W1_i)         (DWT folded into Linear 1)
      Wtail (768, 128) = [W2cat @ fW1 ; fW2 zero-padded to OC_PAD lanes]
      vecs  (8, 640)   = b1cat | g1cat | be1cat | b2f | fg | fbe | fb2(pad) | 0
    where b2f = (sum_i b2_i) @ fW1 + fb1.
    """
    f64 = lambda a: np.asarray(a, np.float64)
    hid = raw['fW1'].shape[1]
    oc = raw['fW2'].shape[1]
    assert hid == OC_PAD, "Wtail packing assumes hid_chn == OC_PAD"

    d_mats = build_dwt_matrices(PRED_LEN, LEVEL)
    assert [d.shape[1] for d in d_mats] == [w.shape[0] for w in raw['W1']]

    # --- fold DWT into Linear 1 ---
    w1cat = np.concatenate([d @ f64(w) for d, w in zip(d_mats, raw['W1'])], axis=1)
    b1cat = np.concatenate([f64(b) for b in raw['b1']])
    g1cat = np.concatenate([f64(g) for g in raw['g1']])
    be1cat = np.concatenate([f64(b) for b in raw['be1']])

    # --- fold W2 (summed over levels) into fW1 ---
    w2cat = np.concatenate([f64(w) for w in raw['W2']], axis=0)      # (640, oc)
    fw1 = f64(raw['fW1'])
    w2f = w2cat @ fw1                                                 # (640, hid)
    b2f = sum(f64(b) for b in raw['b2']) @ fw1 + f64(raw['fb1'])      # (hid,)

    # --- final Linear, lane-dense padded ---
    fw2p = np.zeros((hid, OC_PAD), np.float64); fw2p[:, :oc] = f64(raw['fW2'])
    fb2p = np.zeros((OC_PAD,), np.float64);     fb2p[:oc] = f64(raw['fb2'])

    wtail = np.concatenate([w2f, fw2p], axis=0)                       # (768, 128)

    def pad640(v):
        o = np.zeros((HCAT,), np.float64); o[:v.shape[0]] = v; return o
    vecs = np.stack([b1cat, g1cat, be1cat,
                     pad640(b2f), pad640(f64(raw['fg'])), pad640(f64(raw['fbe'])),
                     pad640(fb2p), np.zeros((HCAT,), np.float64)], axis=0)

    return dict(W1cat=jnp.asarray(w1cat, jnp.float32),
                Wtail=jnp.asarray(wtail, jnp.float32),
                vecs=jnp.asarray(vecs, jnp.float32))


# ----------------------------- pure-JAX reference (mirrors the module) -------
def reference_forward(x, raw):
    dot = functools.partial(jnp.dot, precision=jax.lax.Precision.HIGHEST)
    b, L, c = x.shape
    r = b * c
    rows = jnp.transpose(x, (0, 2, 1)).reshape(r, L)
    coeffs = wavedec_rows(rows, LEVEL)
    acc = jnp.zeros((r, raw['W2'][0].shape[1]), jnp.float32)
    for i, co in enumerate(coeffs):
        h = dot(co, raw['W1'][i]) + raw['b1'][i]
        h = _layernorm(_gelu(h), raw['g1'][i], raw['be1'][i])
        acc = acc + dot(h, raw['W2'][i]) + raw['b2'][i]
    h2 = dot(acc, raw['fW1']) + raw['fb1']
    h2 = _layernorm(_gelu(h2), raw['fg'], raw['fbe'])
    out = dot(h2, raw['fW2']) + raw['fb2']
    return jnp.transpose(out.reshape(b, c, -1), (0, 2, 1))


# ----------------------------- main ------------------------------------------
if __name__ == "__main__":
    key = jax.random.PRNGKey(0)
    kx, kt, kp = jax.random.split(key, 3)

    B = 2
    x = jax.random.normal(kx, (B, PRED_LEN, IN_CHN), jnp.float32)
    x_time = jax.random.normal(kt, (B, PRED_LEN, 4), jnp.float32)  # unused

    feature = wt_features()            # [12, 12, 18, 29, 51]
    raw = init_raw_params(kp, feature)
    packed = pack_params(raw)

    y_pred, x_out = wtnet_forward(x, x_time, packed)
    y_pred = jax.block_until_ready(y_pred)

    assert y_pred.shape == (B, OUT_CHN, IN_CHN)
    y_ref = reference_forward(x, raw)
    max_err = float(jnp.max(jnp.abs(y_pred - y_ref)))
    assert jnp.allclose(y_pred, y_ref, atol=2e-3, rtol=2e-3), max_err

    print("KERNEL_OK")
</pallas_src>

<mosaic_0001>
module attributes {stable_mosaic.version = 11 : i64} {
  func.func @wtnet_kernel(%arg0: memref<14x96xf32, #tpu.memory_space<vmem>>, %arg1: memref<96x640xf32, #tpu.memory_space<vmem>>, %arg2: memref<768x128xf32, #tpu.memory_space<vmem>>, %arg3: memref<8x640xf32, #tpu.memory_space<vmem>>, %arg4: memref<14x128xf32, #tpu.memory_space<vmem>>) attributes {dimension_semantics = [], scalar_prefetch = 0 : i64, scratch_operands = 0 : i64, tpu.core_type = #tpu.core_type<tc>} {
    %c0 = arith.constant 0 : index
    %c0_0 = arith.constant 0 : index
    %0 = vector.load %arg0[%c0, %c0_0] : memref<14x96xf32, #tpu.memory_space<vmem>>, vector<14x96xf32>
    %c0_1 = arith.constant 0 : index
    %c0_2 = arith.constant 0 : index
    %1 = vector.load %arg1[%c0_1, %c0_2] : memref<96x640xf32, #tpu.memory_space<vmem>>, vector<96x640xf32>
    %cst = arith.constant dense<0.000000e+00> : vector<14x640xf32>
    %2 = tpu.matmul %0, %1, %cst {dimension_numbers = #tpu.dot_dimension_numbers<[1], [0], [0], [1], [0, 0, 1, 1], [], []>} : vector<14x96xf32>, vector<96x640xf32>, vector<14x640xf32> -> vector<14x640xf32>
    %c0_3 = arith.constant 0 : index
    %c0_4 = arith.constant 0 : index
    %3 = vector.load %arg3[%c0_3, %c0_4] : memref<8x640xf32, #tpu.memory_space<vmem>>, vector<1x640xf32>
    %4 = vector.broadcast %3 : vector<1x640xf32> to vector<14x640xf32>
    %5 = arith.addf %2, %4 : vector<14x640xf32>
    %cst_5 = arith.constant 5.000000e-01 : f32
    %6 = vector.broadcast %cst_5 : f32 to vector<14x640xf32>
    %7 = arith.mulf %6, %5 : vector<14x640xf32>
    %cst_6 = arith.constant 4.471500e-02 : f32
    %8 = vector.broadcast %cst_6 : f32 to vector<14x640xf32>
    %9 = arith.mulf %8, %5 : vector<14x640xf32>
    %10 = arith.mulf %9, %5 : vector<14x640xf32>
    %11 = arith.mulf %10, %5 : vector<14x640xf32>
    %12 = arith.addf %5, %11 : vector<14x640xf32>
    %cst_7 = arith.constant 0.797884583 : f32
    %13 = vector.broadcast %cst_7 : f32 to vector<14x640xf32>
    %14 = arith.mulf %13, %12 : vector<14x640xf32>
    %15 = math.tanh %14 : vector<14x640xf32>
    %cst_8 = arith.constant 1.000000e+00 : f32
    %16 = vector.broadcast %cst_8 : f32 to vector<14x640xf32>
    %17 = arith.addf %16, %15 : vector<14x640xf32>
    %18 = arith.mulf %7, %17 : vector<14x640xf32>
    %19 = vector.extract_strided_slice %18 {offsets = [0, 0], sizes = [14, 128], strides = [1, 1]} : vector<14x640xf32> to vector<14x128xf32>
    %c1 = arith.constant 1 : index
    %c0_9 = arith.constant 0 : index
    %20 = vector.load %arg3[%c1, %c0_9] : memref<8x640xf32, #tpu.memory_space<vmem>>, vector<1x128xf32>
    %c2 = arith.constant 2 : index
    %c0_10 = arith.constant 0 : index
    %21 = vector.load %arg3[%c2, %c0_10] : memref<8x640xf32, #tpu.memory_space<vmem>>, vector<1x128xf32>
    %cst_11 = arith.constant dense<0.000000e+00> : vector<14xf32>
    %22 = vector.multi_reduction <add>, %19, %cst_11 [1] : vector<14x128xf32> to vector<14xf32>
    %23 = vector.shape_cast %22 : vector<14xf32> to vector<14x1xf32>
    %cst_12 = arith.constant 1.280000e+02 : f32
    %24 = vector.broadcast %cst_12 : f32 to vector<14x1xf32>
    %25 = arith.divf %23, %24 : vector<14x1xf32>
    %26 = arith.mulf %19, %19 : vector<14x128xf32>
    %cst_13 = arith.constant dense<0.000000e+00> : vector<14xf32>
    %27 = vector.multi_reduction <add>, %26, %cst_13 [1] : vector<14x128xf32> to vector<14xf32>
    %28 = vector.shape_cast %27 : vector<14xf32> to vector<14x1xf32>
    %cst_14 = arith.constant 1.280000e+02 : f32
    %29 = vector.broadcast %cst_14 : f32 to vector<14x1xf32>
    %30 = arith.divf %28, %29 : vector<14x1xf32>
    %31 = arith.mulf %25, %25 : vector<14x1xf32>
    %32 = arith.subf %30, %31 : vector<14x1xf32>
    %33 = vector.broadcast %25 : vector<14x1xf32> to vector<14x128xf32>
    %34 = arith.subf %19, %33 : vector<14x128xf32>
    %cst_15 = arith.constant 9.99999974E-6 : f32
    %35 = vector.broadcast %cst_15 : f32 to vector<14x1xf32>
    %36 = arith.addf %32, %35 : vector<14x1xf32>
    %37 = math.rsqrt %36 : vector<14x1xf32>
    %38 = vector.broadcast %37 : vector<14x1xf32> to vector<14x128xf32>
    %39 = arith.mulf %34, %38 : vector<14x128xf32>
    %40 = vector.broadcast %20 : vector<1x128xf32> to vector<14x128xf32>
    %41 = arith.mulf %39, %40 : vector<14x128xf32>
    %42 = vector.broadcast %21 : vector<1x128xf32> to vector<14x128xf32>
    %43 = arith.addf %41, %42 : vector<14x128xf32>
    %44 = vector.extract_strided_slice %18 {offsets = [0, 128], sizes = [14, 128], strides = [1, 1]} : vector<14x640xf32> to vector<14x128xf32>
    %c1_16 = arith.constant 1 : index
    %c128 = arith.constant 128 : index
    %45 = vector.load %arg3[%c1_16, %c128] : memref<8x640xf32, #tpu.memory_space<vmem>>, vector<1x128xf32>
    %c2_17 = arith.constant 2 : index
    %c128_18 = arith.constant 128 : index
    %46 = vector.load %arg3[%c2_17, %c128_18] : memref<8x640xf32, #tpu.memory_space<vmem>>, vector<1x128xf32>
    %cst_19 = arith.constant dense<0.000000e+00> : vector<14xf32>
    %47 = vector.multi_reduction <add>, %44, %cst_19 [1] : vector<14x128xf32> to vector<14xf32>
    %48 = vector.shape_cast %47 : vector<14xf32> to vector<14x1xf32>
    %cst_20 = arith.constant 1.280000e+02 : f32
    %49 = vector.broadcast %cst_20 : f32 to vector<14x1xf32>
    %50 = arith.divf %48, %49 : vector<14x1xf32>
    %51 = arith.mulf %44, %44 : vector<14x128xf32>
    %cst_21 = arith.constant dense<0.000000e+00> : vector<14xf32>
    %52 = vector.multi_reduction <add>, %51, %cst_21 [1] : vector<14x128xf32> to vector<14xf32>
    %53 = vector.shape_cast %52 : vector<14xf32> to vector<14x1xf32>
    %cst_22 = arith.constant 1.280000e+02 : f32
    %54 = vector.broadcast %cst_22 : f32 to vector<14x1xf32>
    %55 = arith.divf %53, %54 : vector<14x1xf32>
    %56 = arith.mulf %50, %50 : vector<14x1xf32>
    %57 = arith.subf %55, %56 : vector<14x1xf32>
    %58 = vector.broadcast %50 : vector<14x1xf32> to vector<14x128xf32>
    %59 = arith.subf %44, %58 : vector<14x128xf32>
    %cst_23 = arith.constant 9.99999974E-6 : f32
    %60 = vector.broadcast %cst_23 : f32 to vector<14x1xf32>
    %61 = arith.addf %57, %60 : vector<14x1xf32>
    %62 = math.rsqrt %61 : vector<14x1xf32>
    %63 = vector.broadcast %62 : vector<14x1xf32> to vector<14x128xf32>
    %64 = arith.mulf %59, %63 : vector<14x128xf32>
    %65 = vector.broadcast %45 : vector<1x128xf32> to vector<14x128xf32>
    %66 = arith.mulf %64, %65 : vector<14x128xf32>
    %67 = vector.broadcast %46 : vector<1x128xf32> to vector<14x128xf32>
    %68 = arith.addf %66, %67 : vector<14x128xf32>
    %69 = vector.extract_strided_slice %18 {offsets = [0, 256], sizes = [14, 128], strides = [1, 1]} : vector<14x640xf32> to vector<14x128xf32>
    %c1_24 = arith.constant 1 : index
    %c256 = arith.constant 256 : index
    %70 = vector.load %arg3[%c1_24, %c256] : memref<8x640xf32, #tpu.memory_space<vmem>>, vector<1x128xf32>
    %c2_25 = arith.constant 2 : index
    %c256_26 = arith.constant 256 : index
    %71 = vector.load %arg3[%c2_25, %c256_26] : memref<8x640xf32, #tpu.memory_space<vmem>>, vector<1x128xf32>
    %cst_27 = arith.constant dense<0.000000e+00> : vector<14xf32>
    %72 = vector.multi_reduction <add>, %69, %cst_27 [1] : vector<14x128xf32> to vector<14xf32>
    %73 = vector.shape_cast %72 : vector<14xf32> to vector<14x1xf32>
    %cst_28 = arith.constant 1.280000e+02 : f32
    %74 = vector.broadcast %cst_28 : f32 to vector<14x1xf32>
    %75 = arith.divf %73, %74 : vector<14x1xf32>
    %76 = arith.mulf %69, %69 : vector<14x128xf32>
    %cst_29 = arith.constant dense<0.000000e+00> : vector<14xf32>
    %77 = vector.multi_reduction <add>, %76, %cst_29 [1] : vector<14x128xf32> to vector<14xf32>
    %78 = vector.shape_cast %77 : vector<14xf32> to vector<14x1xf32>
    %cst_30 = arith.constant 1.280000e+02 : f32
    %79 = vector.broadcast %cst_30 : f32 to vector<14x1xf32>
    %80 = arith.divf %78, %79 : vector<14x1xf32>
    %81 = arith.mulf %75, %75 : vector<14x1xf32>
    %82 = arith.subf %80, %81 : vector<14x1xf32>
    %83 = vector.broadcast %75 : vector<14x1xf32> to vector<14x128xf32>
    %84 = arith.subf %69, %83 : vector<14x128xf32>
    %cst_31 = arith.constant 9.99999974E-6 : f32
    %85 = vector.broadcast %cst_31 : f32 to vector<14x1xf32>
    %86 = arith.addf %82, %85 : vector<14x1xf32>
    %87 = math.rsqrt %86 : vector<14x1xf32>
    %88 = vector.broadcast %87 : vector<14x1xf32> to vector<14x128xf32>
    %89 = arith.mulf %84, %88 : vector<14x128xf32>
    %90 = vector.broadcast %70 : vector<1x128xf32> to vector<14x128xf32>
    %91 = arith.mulf %89, %90 : vector<14x128xf32>
    %92 = vector.broadcast %71 : vector<1x128xf32> to vector<14x128xf32>
    %93 = arith.addf %91, %92 : vector<14x128xf32>
    %94 = vector.extract_strided_slice %18 {offsets = [0, 384], sizes = [14, 128], strides = [1, 1]} : vector<14x640xf32> to vector<14x128xf32>
    %c1_32 = arith.constant 1 : index
    %c384 = arith.constant 384 : index
    %95 = vector.load %arg3[%c1_32, %c384] : memref<8x640xf32, #tpu.memory_space<vmem>>, vector<1x128xf32>
    %c2_33 = arith.constant 2 : index
    %c384_34 = arith.constant 384 : index
    %96 = vector.load %arg3[%c2_33, %c384_34] : memref<8x640xf32, #tpu.memory_space<vmem>>, vector<1x128xf32>
    %cst_35 = arith.constant dense<0.000000e+00> : vector<14xf32>
    %97 = vector.multi_reduction <add>, %94, %cst_35 [1] : vector<14x128xf32> to vector<14xf32>
    %98 = vector.shape_cast %97 : vector<14xf32> to vector<14x1xf32>
    %cst_36 = arith.constant 1.280000e+02 : f32
    %99 = vector.broadcast %cst_36 : f32 to vector<14x1xf32>
    %100 = arith.divf %98, %99 : vector<14x1xf32>
    %101 = arith.mulf %94, %94 : vector<14x128xf32>
    %cst_37 = arith.constant dense<0.000000e+00> : vector<14xf32>
    %102 = vector.multi_reduction <add>, %101, %cst_37 [1] : vector<14x128xf32> to vector<14xf32>
    %103 = vector.shape_cast %102 : vector<14xf32> to vector<14x1xf32>
    %cst_38 = arith.constant 1.280000e+02 : f32
    %104 = vector.broadcast %cst_38 : f32 to vector<14x1xf32>
    %105 = arith.divf %103, %104 : vector<14x1xf32>
    %106 = arith.mulf %100, %100 : vector<14x1xf32>
    %107 = arith.subf %105, %106 : vector<14x1xf32>
    %108 = vector.broadcast %100 : vector<14x1xf32> to vector<14x128xf32>
    %109 = arith.subf %94, %108 : vector<14x128xf32>
    %cst_39 = arith.constant 9.99999974E-6 : f32
    %110 = vector.broadcast %cst_39 : f32 to vector<14x1xf32>
    %111 = arith.addf %107, %110 : vector<14x1xf32>
    %112 = math.rsqrt %111 : vector<14x1xf32>
    %113 = vector.broadcast %112 : vector<14x1xf32> to vector<14x128xf32>
    %114 = arith.mulf %109, %113 : vector<14x128xf32>
    %115 = vector.broadcast %95 : vector<1x128xf32> to vector<14x128xf32>
    %116 = arith.mulf %114, %115 : vector<14x128xf32>
    %117 = vector.broadcast %96 : vector<1x128xf32> to vector<14x128xf32>
    %118 = arith.addf %116, %117 : vector<14x128xf32>
    %119 = vector.extract_strided_slice %18 {offsets = [0, 512], sizes = [14, 128], strides = [1, 1]} : vector<14x640xf32> to vector<14x128xf32>
    %c1_40 = arith.constant 1 : index
    %c512 = arith.constant 512 : index
    %120 = vector.load %arg3[%c1_40, %c512] : memref<8x640xf32, #tpu.memory_space<vmem>>, vector<1x128xf32>
    %c2_41 = arith.constant 2 : index
    %c512_42 = arith.constant 512 : index
    %121 = vector.load %arg3[%c2_41, %c512_42] : memref<8x640xf32, #tpu.memory_space<vmem>>, vector<1x128xf32>
    %cst_43 = arith.constant dense<0.000000e+00> : vector<14xf32>
    %122 = vector.multi_reduction <add>, %119, %cst_43 [1] : vector<14x128xf32> to vector<14xf32>
    %123 = vector.shape_cast %122 : vector<14xf32> to vector<14x1xf32>
    %cst_44 = arith.constant 1.280000e+02 : f32
    %124 = vector.broadcast %cst_44 : f32 to vector<14x1xf32>
    %125 = arith.divf %123, %124 : vector<14x1xf32>
    %126 = arith.mulf %119, %119 : vector<14x128xf32>
    %cst_45 = arith.constant dense<0.000000e+00> : vector<14xf32>
    %127 = vector.multi_reduction <add>, %126, %cst_45 [1] : vector<14x128xf32> to vector<14xf32>
    %128 = vector.shape_cast %127 : vector<14xf32> to vector<14x1xf32>
    %cst_46 = arith.constant 1.280000e+02 : f32
    %129 = vector.broadcast %cst_46 : f32 to vector<14x1xf32>
    %130 = arith.divf %128, %129 : vector<14x1xf32>
    %131 = arith.mulf %125, %125 : vector<14x1xf32>
    %132 = arith.subf %130, %131 : vector<14x1xf32>
    %133 = vector.broadcast %125 : vector<14x1xf32> to vector<14x128xf32>
    %134 = arith.subf %119, %133 : vector<14x128xf32>
    %cst_47 = arith.constant 9.99999974E-6 : f32
    %135 = vector.broadcast %cst_47 : f32 to vector<14x1xf32>
    %136 = arith.addf %132, %135 : vector<14x1xf32>
    %137 = math.rsqrt %136 : vector<14x1xf32>
    %138 = vector.broadcast %137 : vector<14x1xf32> to vector<14x128xf32>
    %139 = arith.mulf %134, %138 : vector<14x128xf32>
    %140 = vector.broadcast %120 : vector<1x128xf32> to vector<14x128xf32>
    %141 = arith.mulf %139, %140 : vector<14x128xf32>
    %142 = vector.broadcast %121 : vector<1x128xf32> to vector<14x128xf32>
    %143 = arith.addf %141, %142 : vector<14x128xf32>
    %144 = tpu.concatenate %43, %68, %93, %118, %143 in 1 : vector<14x128xf32>, vector<14x128xf32>, vector<14x128xf32>, vector<14x128xf32>, vector<14x128xf32> -> vector<14x640xf32>
    %c0_48 = arith.constant 0 : index
    %c0_49 = arith.constant 0 : index
    %145 = vector.load %arg2[%c0_48, %c0_49] : memref<768x128xf32, #tpu.memory_space<vmem>>, vector<640x128xf32>
    %cst_50 = arith.constant dense<0.000000e+00> : vector<14x128xf32>
    %146 = tpu.matmul %144, %145, %cst_50 {dimension_numbers = #tpu.dot_dimension_numbers<[1], [0], [0], [1], [0, 0, 1, 1], [], []>} : vector<14x640xf32>, vector<640x128xf32>, vector<14x128xf32> -> vector<14x128xf32>
    %c3 = arith.constant 3 : index
    %c0_51 = arith.constant 0 : index
    %147 = vector.load %arg3[%c3, %c0_51] : memref<8x640xf32, #tpu.memory_space<vmem>>, vector<1x128xf32>
    %148 = vector.broadcast %147 : vector<1x128xf32> to vector<14x128xf32>
    %149 = arith.addf %146, %148 : vector<14x128xf32>
    %cst_52 = arith.constant 5.000000e-01 : f32
    %150 = vector.broadcast %cst_52 : f32 to vector<14x128xf32>
    %151 = arith.mulf %150, %149 : vector<14x128xf32>
    %cst_53 = arith.constant 4.471500e-02 : f32
    %152 = vector.broadcast %cst_53 : f32 to vector<14x128xf32>
    %153 = arith.mulf %152, %149 : vector<14x128xf32>
    %154 = arith.mulf %153, %149 : vector<14x128xf32>
    %155 = arith.mulf %154, %149 : vector<14x128xf32>
    %156 = arith.addf %149, %155 : vector<14x128xf32>
    %cst_54 = arith.constant 0.797884583 : f32
    %157 = vector.broadcast %cst_54 : f32 to vector<14x128xf32>
    %158 = arith.mulf %157, %156 : vector<14x128xf32>
    %159 = math.tanh %158 : vector<14x128xf32>
    %cst_55 = arith.constant 1.000000e+00 : f32
    %160 = vector.broadcast %cst_55 : f32 to vector<14x128xf32>
    %161 = arith.addf %160, %159 : vector<14x128xf32>
    %162 = arith.mulf %151, %161 : vector<14x128xf32>
    %c4 = arith.constant 4 : index
    %c0_56 = arith.constant 0 : index
    %163 = vector.load %arg3[%c4, %c0_56] : memref<8x640xf32, #tpu.memory_space<vmem>>, vector<1x128xf32>
    %c5 = arith.constant 5 : index
    %c0_57 = arith.constant 0 : index
    %164 = vector.load %arg3[%c5, %c0_57] : memref<8x640xf32, #tpu.memory_space<vmem>>, vector<1x128xf32>
    %cst_58 = arith.constant dense<0.000000e+00> : vector<14xf32>
    %165 = vector.multi_reduction <add>, %162, %cst_58 [1] : vector<14x128xf32> to vector<14xf32>
    %166 = vector.shape_cast %165 : vector<14xf32> to vector<14x1xf32>
    %cst_59 = arith.constant 1.280000e+02 : f32
    %167 = vector.broadcast %cst_59 : f32 to vector<14x1xf32>
    %168 = arith.divf %166, %167 : vector<14x1xf32>
    %169 = arith.mulf %162, %162 : vector<14x128xf32>
    %cst_60 = arith.constant dense<0.000000e+00> : vector<14xf32>
    %170 = vector.multi_reduction <add>, %169, %cst_60 [1] : vector<14x128xf32> to vector<14xf32>
    %171 = vector.shape_cast %170 : vector<14xf32> to vector<14x1xf32>
    %cst_61 = arith.constant 1.280000e+02 : f32
    %172 = vector.broadcast %cst_61 : f32 to vector<14x1xf32>
    %173 = arith.divf %171, %172 : vector<14x1xf32>
    %174 = arith.mulf %168, %168 : vector<14x1xf32>
    %175 = arith.subf %173, %174 : vector<14x1xf32>
    %176 = vector.broadcast %168 : vector<14x1xf32> to vector<14x128xf32>
    %177 = arith.subf %162, %176 : vector<14x128xf32>
    %cst_62 = arith.constant 9.99999974E-6 : f32
    %178 = vector.broadcast %cst_62 : f32 to vector<14x1xf32>
    %179 = arith.addf %175, %178 : vector<14x1xf32>
    %180 = math.rsqrt %179 : vector<14x1xf32>
    %181 = vector.broadcast %180 : vector<14x1xf32> to vector<14x128xf32>
    %182 = arith.mulf %177, %181 : vector<14x128xf32>
    %183 = vector.broadcast %163 : vector<1x128xf32> to vector<14x128xf32>
    %184 = arith.mulf %182, %183 : vector<14x128xf32>
    %185 = vector.broadcast %164 : vector<1x128xf32> to vector<14x128xf32>
    %186 = arith.addf %184, %185 : vector<14x128xf32>
    %c640 = arith.constant 640 : index
    %c0_63 = arith.constant 0 : index
    %187 = vector.load %arg2[%c640, %c0_63] : memref<768x128xf32, #tpu.memory_space<vmem>>, vector<128x128xf32>
    %cst_64 = arith.constant dense<0.000000e+00> : vector<14x128xf32>
    %188 = tpu.matmul %186, %187, %cst_64 {dimension_numbers = #tpu.dot_dimension_numbers<[1], [0], [0], [1], [0, 0, 1, 1], [], []>} : vector<14x128xf32>, vector<128x128xf32>, vector<14x128xf32> -> vector<14x128xf32>
    %c6 = arith.constant 6 : index
    %c0_65 = arith.constant 0 : index
    %189 = vector.load %arg3[%c6, %c0_65] : memref<8x640xf32, #tpu.memory_space<vmem>>, vector<1x128xf32>
    %190 = vector.broadcast %189 : vector<1x128xf32> to vector<14x128xf32>
    %191 = arith.addf %188, %190 : vector<14x128xf32>
    %c0_66 = arith.constant 0 : index
    %c0_67 = arith.constant 0 : index
    %192 = vector.load %arg4[%c0_66, %c0_67] : memref<14x128xf32, #tpu.memory_space<vmem>>, vector<14x128xf32>
    tpu.vector_store %arg4[%c0_66, %c0_67], %191 {strides = array<i32>} : memref<14x128xf32, #tpu.memory_space<vmem>>, vector<14x128xf32>,
    return
  }
}

</mosaic_0001>

<bundles_post_ra>
// kernel: wtnet_forward.1
= control target key start
LH: loop header
LB: loop body
LE: loop exit
PB: predicated region body
PF: predicated region fallthrough
CT: control target
= control target key end

     0   :  { %9 = vsyncpa [#allocation3], 0  ;;  %s1982_s0 = inlined_call_operand.vmem [shape: f32[14,96], index: 0, kind: input, shape index: {}]   ;;  %s1983_s1 = inlined_call_operand.hbm [shape: f32[96,640], index: 1, kind: input, shape index: {}]   ;;  %s1984_s2 = inlined_call_operand.hbm [shape: f32[768,128], index: 2, kind: input, shape index: {}]   ;;  %s1985_s3 = inlined_call_operand.vmem [shape: f32[8,640], index: 3, kind: input, shape index: {}]   ;;  %s1986_s4 = inlined_call_operand.vmem [shape: f32[14,128], index: 4, kind: output, shape index: {}]  }
   0x1   :  { %10 = vsyncpa [#allocation5], 0  ;;  %s1624_s15 = smov [#allocation2]   ;;  %s1576_s19 = scalar_lea.hbm %s1983_s1, 7680 }
   0x2   :  { %s18_s16 = sshll.u32 %s1624_s15, 4  ;;  %p1577_p0 = scmp.ne.s32.totalorder %s1983_s1, %s1576_s19  ;;  %s19_s16 = int_to_ptr.vmem [resolvable:$true] %s18_s16 }
   0x3   :  { %p1580_p1 = scmp.lt.u32.totalorder %s1576_s19, %s1983_s1 }
   0x5   :  { %p1582_p2 = pnand %p1580_p1, %p1577_p0 }
   0x7   :  { %1585 = shalt.err (!%p1582_p2)
}
   0x8   :  { %s1586_s24 = scalar_lea.vmem %s19_s16, 7680  ;;  %p1591_p4 = scmp.lt.s32.totalorder %s19_s16, %s19_s16 }
   0x9   :  { %p1587_p3 = scmp.ne.s32.totalorder %s19_s16, %s1586_s24  ;;  %p1592_p5 = scmp.lt.s32.totalorder %s1586_s24, %s1586_s24 }
   0xb   :  { %p1593_p6 = por %p1592_p5, %p1591_p4 }
   0xd   :  { %p1594_p7 = pnand %p1593_p6, %p1587_p3 }
   0xf   :  { %1597 = shalt.err (!%p1594_p7)
}
  0x10   :  { %s1625_s25 = smov 640   ;;  %s1626_s26 = smov 40  }
  0x11   :  { %24 = dma.hbm_to_vmem [thread:$0]  %s1983_s1, 7680, %s19_s16, [#allocation3], %s1625_s25, %s1625_s25, %s1626_s26  }
  0x12   :  { %s1627_s29 = smov [#allocation4]   ;;  %s1598_s7 = scalar_lea.hbm %s1984_s2, 12288 }
  0x13   :  { %s30_s30 = sshll.u32 %s1627_s29, 4  ;;  %p1599_p8 = scmp.ne.s32.totalorder %s1984_s2, %s1598_s7  ;;  %s31_s30 = int_to_ptr.vmem [resolvable:$true] %s30_s30 }
  0x14   :  { %p1602_p9 = scmp.lt.u32.totalorder %s1598_s7, %s1984_s2 }
  0x16   :  { %p1604_p10 = pnand %p1602_p9, %p1599_p8 }
  0x18   :  { %1607 = shalt.err (!%p1604_p10)
}
  0x19   :  { %s1608_s12 = scalar_lea.vmem %s31_s30, 12288  ;;  %p1613_p12 = scmp.lt.s32.totalorder %s31_s30, %s31_s30 }
  0x1a   :  { %p1609_p11 = scmp.ne.s32.totalorder %s31_s30, %s1608_s12  ;;  %p1614_p13 = scmp.lt.s32.totalorder %s1608_s12, %s1608_s12 }
  0x1c   :  { %p1615_p0 = por %p1614_p13, %p1613_p12 }
  0x1e   :  { %p1616_p1 = pnand %p1615_p0, %p1609_p11 }
  0x20   :  { %1619 = shalt.err (!%p1616_p1)
}
  0x21   :  { %s1628_s1 = smov 128   ;;  %s1629_s13 = smov 8  }
  0x22   :  { %36 = dma.hbm_to_vmem [thread:$0]  %s1984_s2, 12288, %s31_s30, [#allocation5], %s1628_s1, %s1628_s1, %s1629_s13  }
  0x23   :  { %1620 = dma.done.wait [#allocation3], 7680  }
  0x24   :  { %1621 = vsyncadd [#allocation3], 4294959616 }
  0x25   :  { %1622 = dma.done.wait [#allocation5], 12288  }
  0x26   :  { %1623 = vsyncadd [#allocation5], 4294955008  ;;  %v1630_v0 = vmov 0.0   ;;  %v48_v1 = vld [vmem:[#allocation2 + $0x8] sm:$0xff]  ;;  %v53_v2 = vld [vmem:[#allocation2 + $0x30] sm:$0xff]  ;;  %vm136_vm0 = vcmask 785408  }
  0x27   :  { %207 = vmatprep.mubr.f32.mxu0 %v1630_v0  ;;  %284 = vmatprep.mubr.f32.mxu1 %v1630_v0  ;;  %v50_v3 = vld [vmem:[#allocation2 + $0x18] sm:$0xff]  ;;  %v1321_v4 = vpack.c.bf16 %v53_v2, %v48_v1  ;;  %v55_v5 = vld [vmem:[#allocation2 + $0x40] sm:$0xff]  ;;  %v52_v7 = vld [vmem:[#allocation2 + $0x28] sm:$0xff]  ;;  %vm466_vm1 = vcmask 1045504  }
  0x28   :  { %v47_v6 = vld [vmem:[#allocation2] sm:$0xff]  ;;  %v1345_v8 = vpack.c.bf16 %v55_v5, %v50_v3  ;;  %v49_v10 = vld [vmem:[#allocation2 + $0x10] sm:$0xff]  ;;  %v54_v11 = vld [vmem:[#allocation2 + $0x38] sm:$0xff] }
  0x29   :  { %v1323_v9 = vpack.c.bf16 %v52_v7, %v47_v6  ;;  %v58_v12 = vld [vmem:[#allocation2 + $0x58] sm:$0xff]  ;;  %1322 = vmatprep.subr.bf16.mxu0 %v1321_v4  ;;  %v1347_v13 = vpack.c.bf16 %v54_v11, %v49_v10  ;;  %v63_v14 = vld [vmem:[#allocation2 + $0x80] sm:$0xff]  ;;  %v60_v15 = vld [vmem:[#allocation2 + $0x68] sm:$0xff] }
  0x2a   :  { %v65_v16 = vld [vmem:[#allocation2 + $0x90] sm:$0xff]  ;;  %1346 = vmatprep.subr.bf16.mxu1 %v1345_v8  ;;  %v1325_v17 = vpack.c.bf16 %v63_v14, %v58_v12  ;;  %v62_v20 = vld [vmem:[#allocation2 + $0x78] sm:$0xff]  ;;  %v59_v21 = vld [vmem:[#allocation2 + $0x60] sm:$0xff] }
  0x2b   :  { %1324 = vmatpush1.bf16.msra.mxu0 %v1323_v9  ;;  %v1349_v18 = vpack.c.bf16 %v65_v16, %v60_v15  ;;  %v57_v19 = vld [vmem:[#allocation2 + $0x50] sm:$0xff]  ;;  %1348 = vmatpush1.bf16.msra.mxu1 %v1347_v13  ;;  %v64_v23 = vld [vmem:[#allocation2 + $0x88] sm:$0xff]  ;;  %v70_v28 = vld [vmem:[#allocation2 + $0xb8] sm:$0xff] }
  0x2c   :  { %v1327_v22 = vpack.c.bf16 %v62_v20, %v57_v19  ;;  %v68_v24 = vld [vmem:[#allocation2 + $0xa8] sm:$0xff]  ;;  %v73_v25 = vld [vmem:[#allocation2 + $0xd0] sm:$0xff]  ;;  %1326 = vmatprep.subr.bf16.mxu0 %v1325_v17  ;;  %v1351_v26 = vpack.c.bf16 %v64_v23, %v59_v21  ;;  %v75_v29 = vld [vmem:[#allocation2 + $0xe0] sm:$0xff] }
  0x2d   :  { %1350 = vmatprep.subr.bf16.mxu1 %v1349_v18  ;;  %v1329_v27 = vpack.c.bf16 %v73_v25, %v68_v24  ;;  %v67_v30 = vld [vmem:[#allocation2 + $0xa0] sm:$0xff]  ;;  %v1353_v31 = vpack.c.bf16 %v75_v29, %v70_v28  ;;  %v72_v32 = vld [vmem:[#allocation2 + $0xc8] sm:$0xff]  ;;  %v69_v33 = vld [vmem:[#allocation2 + $0xb0] sm:$0xff] }
  0x2e   :  { %v74_v34 = vld [vmem:[#allocation2 + $0xd8] sm:$0xff]  ;;  %v1331_v35 = vpack.c.bf16 %v72_v32, %v67_v30  ;;  %v83_v37 = vld [vmem:[#allocation2 + $0x120] sm:$0xff]  ;;  %v80_v38 = vld [vmem:[#allocation2 + $0x108] sm:$0xff] }
  0x2f   :  { %1328 = vmatpush1.bf16.msra.mxu0 %v1327_v22  ;;  %v78_v36 = vld [vmem:[#allocation2 + $0xf8] sm:$0xff]  ;;  %1352 = vmatpush1.bf16.msra.mxu1 %v1351_v26  ;;  %v1355_v39 = vpack.c.bf16 %v74_v34, %v69_v33  ;;  %v85_v41 = vld [vmem:[#allocation2 + $0x130] sm:$0xff]  ;;  %v79_v45 = vld [vmem:[#allocation2 + $0x100] sm:$0xff] }
  0x30   :  { %1330 = vmatprep.subr.bf16.mxu0 %v1329_v27  ;;  %v1333_v40 = vpack.c.bf16 %v83_v37, %v78_v36  ;;  %v77_v42 = vld [vmem:[#allocation2 + $0xf0] sm:$0xff]  ;;  %v82_v43 = vld [vmem:[#allocation2 + $0x118] sm:$0xff]  ;;  %1354 = vmatprep.subr.bf16.mxu1 %v1353_v31  ;;  %v1357_v44 = vpack.c.bf16 %v85_v41, %v80_v38  ;;  %v84_v46 = vld [vmem:[#allocation2 + $0x128] sm:$0xff] }
  0x31   :  { %v88_v47 = vld [vmem:[#allocation2 + $0x148] sm:$0xff]  ;;  %v93_v48 = vld [vmem:[#allocation2 + $0x170] sm:$0xff]  ;;  %v90_v49 = vld [vmem:[#allocation2 + $0x158] sm:$0xff]  ;;  %v1335_v51 = vpack.c.bf16 %v82_v43, %v77_v42  ;;  %v1359_v52 = vpack.c.bf16 %v84_v46, %v79_v45 }
  0x32   :  { %v95_v50 = vld [vmem:[#allocation2 + $0x180] sm:$0xff]  ;;  %v1337_v53 = vpack.c.bf16 %v93_v48, %v88_v47  ;;  %v92_v55 = vld [vmem:[#allocation2 + $0x168] sm:$0xff]  ;;  %v89_v56 = vld [vmem:[#allocation2 + $0x150] sm:$0xff] }
  0x33   :  { %1332 = vmatpush1.bf16.msra.mxu0 %v1331_v35  ;;  %1356 = vmatpush1.bf16.msra.mxu1 %v1355_v39  ;;  %v87_v54 = vld [vmem:[#allocation2 + $0x140] sm:$0xff]  ;;  %v1361_v57 = vpack.c.bf16 %v95_v50, %v90_v49  ;;  %v94_v58 = vld [vmem:[#allocation2 + $0x178] sm:$0xff]  ;;  %v100_v61 = vld [vmem:[#allocation2 + $0x1a8] sm:$0xff]  ;;  %v111_v35 = vlaneseq }
  0x34   :  { %1334 = vmatprep.subr.bf16.mxu0 %v1333_v40  ;;  %1358 = vmatprep.subr.bf16.mxu1 %v1357_v44  ;;  %v98_v59 = vld [vmem:[#allocation2 + $0x198] sm:$0xff]  ;;  %v103_v60 = vld [vmem:[#allocation2 + $0x1c0] sm:$0xff]  ;;  %v105_v62 = vld [vmem:[#allocation2 + $0x1d0] sm:$0xff]  ;;  %v1339_v63 = vpack.c.bf16 %v92_v55, %v87_v54  ;;  %v1363_v1 = vpack.c.bf16 %v94_v58, %v89_v56 }
  0x35   :  { %v1341_v2 = vpack.c.bf16 %v103_v60, %v98_v59  ;;  %v97_v3 = vld [vmem:[#allocation2 + $0x190] sm:$0xff]  ;;  %v102_v4 = vld [vmem:[#allocation2 + $0x1b8] sm:$0xff]  ;;  %v99_v5 = vld [vmem:[#allocation2 + $0x1a0] sm:$0xff]  ;;  %v1365_v6 = vpack.c.bf16 %v105_v62, %v100_v61  ;;  %v1696_v36 = vshrl.u32 %v111_v35, 7 }
  0x36   :  { %v104_v7 = vld [vmem:[#allocation2 + $0x1c8] sm:$0xff]  ;;  %v51_v8 = vld [vmem:[#allocation2 + $0x20] sm:$0xff]  ;;  %v1343_v10 = vpack.c.bf16 %v102_v4, %v97_v3  ;;  %v61_v13 = vld [vmem:[#allocation2 + $0x70] sm:$0xff] }
  0x37   :  { %1336 = vmatpush1.bf16.msra.mxu0 %v1335_v51  ;;  %1360 = vmatpush1.bf16.msra.mxu1 %v1359_v52  ;;  %v56_v9 = vld [vmem:[#allocation2 + $0x48] sm:$0xff]  ;;  %v1367_v11 = vpack.c.bf16 %v104_v7, %v99_v5  ;;  %v66_v14 = vld [vmem:[#allocation2 + $0x98] sm:$0xff]  ;;  %v45_v15 = vld [vmem:[%s1982_s0] sm:$0xff]  ;;  %v113_v40 = vsub.s32 0, %v1696_v36  ;;  %v121_v41 = vsub.s32 2, %v1696_v36  ;;  %v117_v42 = vsub.s32 1, %v1696_v36 }
  0x38   :  { %1338 = vmatprep.subr.bf16.mxu0 %v1337_v53  ;;  %1362 = vmatprep.subr.bf16.mxu1 %v1361_v57  ;;  %v1369_v12 = vpack.c.bf16 %v56_v9, %v51_v8  ;;  %v1373_v16 = vpack.c.bf16 %v66_v14, %v61_v13  ;;  %v71_v17 = vld [vmem:[#allocation2 + $0xc0] sm:$0xff]  ;;  %v76_v18 = vld [vmem:[#allocation2 + $0xe8] sm:$0xff]  ;;  %v81_v21 = vld [vmem:[#allocation2 + $0x110] sm:$0xff]  ;;  %v125_v43 = vsub.s32 3, %v1696_v36 }
  0x39   :  { %v46_v19 = vld [vmem:[%s1982_s0 + $0x8] sm:$0x3f]  ;;  %v1377_v20 = vpack.c.bf16 %v76_v18, %v71_v17  ;;  %v86_v22 = vld [vmem:[#allocation2 + $0x138] sm:$0xff]  ;;  %v91_v24 = vld [vmem:[#allocation2 + $0x160] sm:$0xff] }
  0x3a   :  { %v1381_v23 = vpack.c.bf16 %v86_v22, %v81_v21  ;;  %v96_v25 = vld [vmem:[#allocation2 + $0x188] sm:$0xff]  ;;  %v101_v27 = vld [vmem:[#allocation2 + $0x1b0] sm:$0xff]  ;;  %v650_v29 = vld [vmem:[#allocation4 + $0x80] sm:$0xff] }
  0x3b   :  { %1340 = vmatpush1.bf16.msra.mxu0 %v1339_v63  ;;  %1364 = vmatpush1.bf16.msra.mxu1 %v1363_v1  ;;  %v1385_v26 = vpack.c.bf16 %v96_v25, %v91_v24  ;;  %v651_v30 = vld [vmem:[#allocation4 + $0x88] sm:$0xff]  ;;  %v634_v31 = vld [vmem:[#allocation4] sm:$0xff] }
  0x3c   :  { %1342 = vmatprep.subr.bf16.mxu0 %v1341_v2  ;;  %1366 = vmatprep.subr.bf16.mxu1 %v1365_v6  ;;  %v1393_v32 = vpack.c.bf16 %v651_v30, %v650_v29  ;;  %v635_v33 = vld [vmem:[#allocation4 + $0x8] sm:$0xff]  ;;  %v108_v38 = vld [vmem:[%s1985_s3] ss:$8 sm:$0x10] }
  0x3d   :  { %v1395_v34 = vpack.c.bf16 %v635_v33, %v634_v31  ;;  %v107_v37 = vld [vmem:[%s1985_s3] ss:$8 sm:$0xf] }
  0x3e   :  { %v1704_v39 = vor.u32 %v108_v38, %v107_v37 }
  0x3f   :  { %1344 = vmatpush1.bf16.msra.mxu0 %v1343_v10  ;;  %1368 = vmatpush1.bf16.msra.mxu1 %v1367_v11 }
  0x40   :  { %1370 = vmatprep.subr.bf16.mxu0 %v1369_v12  ;;  %1394 = vmatprep.subr.bf16.mxu1 %v1393_v32  ;;  %v114_v44 = vrot.slane %v1704_v39, %v113_v40  ;;  %v122_v45 = vrot.slane %v1704_v39, %v121_v41  ;;  %v118_v46 = vrot.slane %v1704_v39, %v117_v42 }
  0x41   :  { %v126_v47 = vrot.slane %v1704_v39, %v125_v43 }
  0x42   :  { %1092 = vmatmul.mubr.msk.f32.vlgmr.msra.gmra.mrb[0].mxu0 %vm136_vm0, %v45_v15  ;;  %1094 = vmatmul.mubr.msk.f32.vlgmr.msra.gmra.mrb[0].mxu1 %vm136_vm0, %v45_v15 }
  0x43   :  { %1372 = vmatpush3.bf16.msra.mxu0 %v1369_v12  ;;  %213 = vmatprep.mubr.f32.mxu0 %v1630_v0 }
  0x44   :  { %290 = vmatprep.mubr.f32.mxu1 %v1630_v0  ;;  %1374 = vmatprep.subr.bf16.mxu0 %v1373_v16  ;;  %v106_v0 = vld [vmem:[#allocation2 + $0x1d8] sm:$0xff] }
  0x45   :  { %v1389_v28 = vpack.c.bf16 %v106_v0, %v101_v27  ;;  %1396 = vmatpush3.bf16.msra.mxu1 %v1395_v34  ;;  %v129_v34 = vsub.s32 4, %v1696_v36 }
  0x46   :  { %1093 = vmatmul.mubr.msk.f32.gmra.mrb[2].mxu0 %vm136_vm0, %v46_v19  ;;  %1095 = vmatmul.mubr.msk.f32.gmra.mrb[2].mxu1 %vm136_vm0, %v46_v19 }
  0x47   :  { %1376 = vmatpush3.bf16.msra.mxu0 %v1373_v16  ;;  %1248 = vmatprep.mubr.msk.f32.mxu0 %vm136_vm0, %v45_v15  ;;  %v130_v40 = vrot.slane %v1704_v39, %v129_v34  ;;  %v637_v34 = vld [vmem:[#allocation4 + $0x18] sm:$0xff] }
  0x48   :  { %1378 = vmatprep.subr.bf16.mxu0 %v1377_v20 }
  0x4b   :  { %1380 = vmatpush3.bf16.msra.mxu0 %v1377_v20 }
  0x4c   :  { %1382 = vmatprep.subr.bf16.mxu0 %v1381_v23 }
  0x4f   :  { %1384 = vmatpush3.bf16.msra.mxu0 %v1381_v23 }
  0x50   :  { %1386 = vmatprep.subr.bf16.mxu0 %v1385_v26 }
  0x53   :  { %1388 = vmatpush3.bf16.msra.mxu0 %v1385_v26 }
  0x54   :  { %1390 = vmatprep.subr.bf16.mxu0 %v1389_v28 }
  0x57   :  { %1392 = vmatpush3.bf16.msra.mxu0 %v1389_v28 }
  0x5a   :  { %1249 = vmatmul.mubr.msk.f32.vlgmr.msra.gmra.mrb[4].mxu0 %vm136_vm0, %v46_v19 }
 0x115   :  { %v209_v48 = vpop.f32.mrb[0].mxu0  ;;  %v286_v50 = vpop.f32.mrb[0].mxu1 }
 0x116   :  { %v1714_v49 = vadd.f32 %v209_v48, %v114_v44  ;;  %v211_v51 = vpop.f32.mrb[1].mxu0  ;;  %v1716_v52 = vadd.f32 %v286_v50, %v122_v45  ;;  %v288_v54 = vpop.f32.mrb[1].mxu1 }
 0x117   :  { %v1718_v53 = vadd.f32 %v211_v51, %v118_v46  ;;  %v1721_v56 = vadd.f32 %v288_v54, %v126_v47 }
 0x118   :  { %v382_v55 = vmul.f32 0.044715, %v1714_v49  ;;  %v384_v57 = vmul.f32 0.044715, %v1716_v52 }
 0x119   :  { %v383_v58 = vmul.f32 0.044715, %v1718_v53  ;;  %v215_v59 = vpop.f32.mrb[2].mxu0  ;;  %v385_v61 = vmul.f32 0.044715, %v1721_v56  ;;  %v292_v63 = vpop.f32.mrb[2].mxu1 }
 0x11a   :  { %v392_v60 = vmul.f32 %v382_v55, %v1714_v49  ;;  %v1727_v62 = vadd.f32 %v215_v59, %v114_v44  ;;  %v217_v1 = vpop.f32.mrb[3].mxu0  ;;  %v394_v2 = vmul.f32 %v384_v57, %v1716_v52  ;;  %v1731_v4 = vadd.f32 %v292_v63, %v122_v45  ;;  %v294_v6 = vpop.f32.mrb[3].mxu1 }
 0x11b   :  { %v393_v3 = vmul.f32 %v383_v58, %v1718_v53  ;;  %v1733_v5 = vadd.f32 %v217_v1, %v118_v46  ;;  %v395_v7 = vmul.f32 %v385_v61, %v1721_v56  ;;  %v1737_v9 = vadd.f32 %v294_v6, %v126_v47 }
 0x11c   :  { %v387_v8 = vmul.f32 0.044715, %v1727_v62  ;;  %v402_v10 = vmul.f32 %v392_v60, %v1714_v49  ;;  %v389_v11 = vmul.f32 0.044715, %v1731_v4  ;;  %v404_v19 = vmul.f32 %v394_v2, %v1716_v52 }
 0x11d   :  { %v388_v12 = vmul.f32 0.044715, %v1733_v5  ;;  %v403_v13 = vmul.f32 %v393_v3, %v1718_v53  ;;  %v405_v16 = vmul.f32 %v395_v7, %v1721_v56  ;;  %v390_v20 = vmul.f32 0.044715, %v1737_v9 }
 0x11e   :  { %v397_v14 = vmul.f32 %v387_v8, %v1727_v62  ;;  %v412_v15 = vadd.f32 %v402_v10, %v1714_v49  ;;  %v399_v23 = vmul.f32 %v389_v11, %v1731_v4  ;;  %v414_v25 = vadd.f32 %v404_v19, %v1716_v52 }
 0x11f   :  { %v398_v17 = vmul.f32 %v388_v12, %v1733_v5  ;;  %v413_v18 = vadd.f32 %v403_v13, %v1718_v53  ;;  %v415_v22 = vadd.f32 %v405_v16, %v1721_v56  ;;  %v400_v30 = vmul.f32 %v390_v20, %v1737_v9 }
 0x120   :  { %v422_v21 = vmul.f32 0.7978846, %v412_v15  ;;  %v407_v26 = vmul.f32 %v397_v14, %v1727_v62  ;;  %v424_v28 = vmul.f32 0.7978846, %v414_v25  ;;  %v409_v33 = vmul.f32 %v399_v23, %v1731_v4 }
 0x121   :  { %v423_v24 = vmul.f32 0.7978846, %v413_v18  ;;  %v425_v27 = vmul.f32 0.7978846, %v415_v22  ;;  %v408_v0 = vmul.f32 %v398_v17, %v1733_v5  ;;  %v410_v37 = vmul.f32 %v400_v30, %v1737_v9 }
 0x122   :  { %1528 = vtanh.f32 %v422_v21  ;;  %v417_v29 = vadd.f32 %v407_v26, %v1727_v62  ;;  %v419_v38 = vadd.f32 %v409_v33, %v1731_v4  ;;  %v372_v45 = vmul.f32 0.5, %v1714_v49  ;;  %v636_v33 = vld [vmem:[#allocation4 + $0x10] sm:$0xff] }
 0x123   :  { %1530 = vtanh.f32 %v423_v24  ;;  %v418_v31 = vadd.f32 %v408_v0, %v1733_v5  ;;  %v420_v42 = vadd.f32 %v410_v37, %v1737_v9  ;;  %v373_v50 = vmul.f32 0.5, %v1718_v53  ;;  %v652_v0 = vld [vmem:[#allocation4 + $0x90] sm:$0xff] }
 0x124   :  { %v427_v32 = vmul.f32 0.7978846, %v417_v29  ;;  %1532 = vtanh.f32 %v425_v27  ;;  %v429_v36 = vmul.f32 0.7978846, %v419_v38  ;;  %v375_v12 = vmul.f32 0.5, %v1721_v56 }
 0x125   :  { %1534 = vtanh.f32 %v424_v28  ;;  %v428_v35 = vmul.f32 0.7978846, %v418_v31  ;;  %v430_v59 = vmul.f32 0.7978846, %v420_v42  ;;  %v374_v14 = vmul.f32 0.5, %v1716_v52  ;;  %v653_v28 = vld [vmem:[#allocation4 + $0x98] sm:$0xff] }
 0x126   :  { %1536 = vtanh.f32 %v427_v32  ;;  %v377_v15 = vmul.f32 0.5, %v1727_v62  ;;  %v378_v52 = vmul.f32 0.5, %v1733_v5  ;;  %v379_v5 = vmul.f32 0.5, %v1731_v4  ;;  %v654_v4 = vld [vmem:[#allocation4 + $0xa0] sm:$0xff] }
 0x127   :  { %1538 = vtanh.f32 %v428_v35  ;;  %v1397_v32 = vpack.c.bf16 %v653_v28, %v652_v0  ;;  %v1399_v37 = vpack.c.bf16 %v637_v34, %v636_v33  ;;  %v380_v38 = vmul.f32 0.5, %v1737_v9  ;;  %v686_v33 = vld [vmem:[#allocation4 + $0x1a0] sm:$0xff] }
 0x128   :  { %1540 = vtanh.f32 %v429_v36 }
 0x129   :  { %1542 = vtanh.f32 %v430_v59  ;;  %1398 = vmatprep.subr.bf16.mxu1 %v1397_v32  ;;  %v644_v32 = vld [vmem:[#allocation4 + $0x50] sm:$0xff] }
 0x12a   :  { %1400 = vmatpush3.bf16.msra.mxu1 %v1399_v37 }
 0x12c   :  { %v1529_v41 = vpop.eup %1528 }
 0x12d   :  { %v1531_v43 = vpop.eup %1530  ;;  %v1250_v44 = vpop.f32.mrb[4].mxu0  ;;  %v442_v46 = vadd.f32 1.0, %v1529_v41 }
 0x12e   :  { %v1765_v47 = vadd.f32 %v1250_v44, %v130_v40  ;;  %v363_v48 = vpop.f32.mrb[5].mxu0  ;;  %v443_v51 = vadd.f32 1.0, %v1531_v43  ;;  %v1533_v39 = vpop.eup %1532 }
 0x12f   :  { %v1768_v54 = vadd.f32 %v363_v48, %v130_v40  ;;  %v1770_v55 = vmul.f32 %v442_v46, %v372_v45  ;;  %v1535_v60 = vpop.eup %1534  ;;  %v445_v2 = vadd.f32 1.0, %v1533_v39  ;;  %v655_v40 = vld [vmem:[#allocation4 + $0xa8] sm:$0xff]  ;;  %v638_v45 = vld [vmem:[#allocation4 + $0x20] sm:$0xff] }
 0x130   :  { %v391_v57 = vmul.f32 0.044715, %v1765_v47  ;;  %v1773_v58 = vmul.f32 %v443_v51, %v373_v50  ;;  %v1537_v63 = vpop.eup %1536  ;;  %v444_v7 = vadd.f32 1.0, %v1535_v60  ;;  %v1401_v44 = vpack.c.bf16 %v655_v40, %v654_v4  ;;  %v639_v46 = vld [vmem:[#allocation4 + $0x28] sm:$0xff]  ;;  %v656_v50 = vld [vmem:[#allocation4 + $0xb0] sm:$0xff]  ;;  %v657_v51 = vld [vmem:[#allocation4 + $0xb8] sm:$0xff] }
 0x131   :  { %v386_v49 = vmul.f32 0.044715, %v1768_v54  ;;  %v473_v61 = vmul.f32 %v1770_v55, %v1770_v55  ;;  %v447_v8 = vadd.f32 1.0, %v1537_v63  ;;  %v1539_v11 = vpop.eup %1538  ;;  %v1791_v17 = vmul.f32 %v445_v2, %v375_v12  ;;  %v682_v63 = vld [vmem:[#allocation4 + $0x180] sm:$0xff]  ;;  %v687_v4 = vld [vmem:[#allocation4 + $0x1a8] sm:$0xff] }
 0x132   :  { %v401_v53 = vmul.f32 %v391_v57, %v1765_v47  ;;  %500 = vadd.xlane.f32.xlu0 %v1773_v58  ;;  %v507_v6 = vmul.f32 %v1773_v58, %v1773_v58  ;;  %v1793_v18 = vmul.f32 %v444_v7, %v374_v14  ;;  %v448_v20 = vadd.f32 1.0, %v1539_v11  ;;  %v1541_v56 = vpop.eup %1540  ;;  %1402 = vmatprep.subr.bf16.mxu1 %v1401_v44  ;;  %v666_v7 = vld [vmem:[#allocation4 + $0x100] sm:$0xff] }
 0x133   :  { %v396_v1 = vmul.f32 %v386_v49, %v1768_v54  ;;  %475 = vadd.xlane.f32.xlu1 %v473_v61  ;;  %v1795_v19 = vmul.f32 %v447_v8, %v377_v15  ;;  %v1543_v25 = vpop.eup %1542  ;;  %v449_v26 = vadd.f32 1.0, %v1541_v56  ;;  %v575_v27 = vmul.f32 %v1791_v17, %v1791_v17  ;;  %v640_v49 = vld [vmem:[#allocation4 + $0x30] sm:$0xff]  ;;  %v641_v61 = vld [vmem:[#allocation4 + $0x38] sm:$0xff]  ;;  %v667_v8 = vld [vmem:[#allocation4 + $0x108] sm:$0xff] }
 0x134   :  { %v411_v3 = vmul.f32 %v401_v53, %v1765_v47  ;;  %v541_v23 = vmul.f32 %v1793_v18, %v1793_v18  ;;  %v1804_v24 = vmul.f32 %v448_v20, %v378_v52  ;;  %v450_v31 = vadd.f32 1.0, %v1543_v25  ;;  %v658_v14 = vld [vmem:[#allocation4 + $0xc0] sm:$0xff]  ;;  %v659_v15 = vld [vmem:[#allocation4 + $0xc8] sm:$0xff]  ;;  %v684_v52 = vld [vmem:[#allocation4 + $0x190] sm:$0xff] }
 0x135   :  { %v406_v10 = vmul.f32 %v396_v1, %v1768_v54  ;;  %v467_v62 = vsel %vm466_vm1, %v1795_v19, 0.0  ;;  %v474_v30 = vmul.f32 %v1795_v19, %v1795_v19  ;;  %v1813_v35 = vmul.f32 %v449_v26, %v379_v5  ;;  %v643_v56 = vld [vmem:[#allocation4 + $0x48] sm:$0xff]  ;;  %v668_v26 = vld [vmem:[#allocation4 + $0x110] sm:$0xff]  ;;  %v670_v40 = vld [vmem:[#allocation4 + $0x120] sm:$0xff] }
 0x136   :  { %464 = vadd.xlane.f32.xlu0 %v1770_v55  ;;  %v421_v13 = vadd.f32 %v411_v3, %v1765_v47  ;;  %v502_v29 = vsel %vm466_vm1, %v1804_v24, 0.0  ;;  %v508_v42 = vmul.f32 %v1804_v24, %v1804_v24  ;;  %v1819_v43 = vmul.f32 %v450_v31, %v380_v38 }
 0x137   :  { %509 = vadd.xlane.f32.xlu1 %v507_v6  ;;  %v416_v16 = vadd.f32 %v406_v10, %v1768_v54  ;;  %v477_v41 = vsel %vm466_vm1, %v474_v30, 0.0  ;;  %v536_v36 = vsel %vm466_vm1, %v1813_v35, 0.0  ;;  %v1403_v48 = vpack.c.bf16 %v639_v46, %v638_v45  ;;  %v683_v6 = vld [vmem:[#allocation4 + $0x188] sm:$0xff]  ;;  %v661_v30 = vld [vmem:[#allocation4 + $0xd8] sm:$0xff]  ;;  %v662_v46 = vld [vmem:[#allocation4 + $0xe0] sm:$0xff] }
 0x138   :  { %v431_v21 = vmul.f32 0.7978846, %v421_v13  ;;  %v511_v57 = vsel %vm466_vm1, %v508_v42, 0.0  ;;  %v576_v59 = vmul.f32 %v1819_v43, %v1819_v43  ;;  %v1405_v60 = vpack.c.bf16 %v657_v51, %v656_v50  ;;  %v647_v50 = vld [vmem:[#allocation4 + $0x68] sm:$0xff]  ;;  %v688_v51 = vld [vmem:[#allocation4 + $0x1b0] sm:$0xff] }
 0x139   :  { %v426_v22 = vmul.f32 0.7978846, %v416_v16  ;;  %1404 = vmatpush3.bf16.msra.mxu1 %v1403_v48  ;;  %v570_v53 = vsel %vm466_vm1, %v1819_v43, 0.0  ;;  %v542_v1 = vmul.f32 %v1813_v35, %v1813_v35  ;;  %v1407_v3 = vpack.c.bf16 %v641_v61, %v640_v49  ;;  %v673_v49 = vld [vmem:[#allocation4 + $0x138] sm:$0xff] }
 0x13a   :  { %568 = vadd.xlane.f32.xlu0 %v1791_v17  ;;  %1544 = vtanh.f32 %v431_v21  ;;  %1406 = vmatprep.subr.bf16.mxu1 %v1405_v60  ;;  %v1425_v10 = vpack.c.bf16 %v683_v6, %v682_v63  ;;  %v1427_v11 = vpack.c.bf16 %v667_v8, %v666_v7  ;;  %v381_v13 = vmul.f32 0.5, %v1765_v47  ;;  %v642_v21 = vld [vmem:[#allocation4 + $0x40] sm:$0xff]  ;;  %v685_v47 = vld [vmem:[#allocation4 + $0x198] sm:$0xff]  ;;  %v672_v60 = vld [vmem:[#allocation4 + $0x130] sm:$0xff] }
 0x13b   :  { %534 = vadd.xlane.f32.xlu1 %v1793_v18  ;;  %1546 = vtanh.f32 %v426_v22  ;;  %v579_v16 = vsel %vm466_vm1, %v576_v59, 0.0  ;;  %v1409_v20 = vpack.c.bf16 %v659_v15, %v658_v14  ;;  %v545_v22 = vsel %vm466_vm1, %v542_v1, 0.0  ;;  %v689_v59 = vld [vmem:[#allocation4 + $0x1b8] sm:$0xff]  ;;  %v690_v7 = vld [vmem:[#allocation4 + $0x1c0] sm:$0xff] }
 0x13c   :  { %1426 = vmatprep.subr.bf16.mxu0 %v1425_v10  ;;  %v1411_v25 = vpack.c.bf16 %v643_v56, %v642_v21  ;;  %v1429_v5 = vpack.c.bf16 %v685_v47, %v684_v52  ;;  %v1433_v42 = vpack.c.bf16 %v687_v4, %v686_v33  ;;  %v1437_v61 = vpack.c.bf16 %v689_v59, %v688_v51  ;;  %v665_v1 = vld [vmem:[#allocation4 + $0xf8] sm:$0xff]  ;;  %v691_v10 = vld [vmem:[#allocation4 + $0x1c8] sm:$0xff]  ;;  %v698_v15 = vld [vmem:[#allocation4 + $0x200] sm:$0xff] }
 0x13d   :  { %1408 = vmatpush3.bf16.msra.mxu1 %v1407_v3  ;;  %1428 = vmatpush3.bf16.msra.mxu0 %v1427_v11  ;;  %v1439_v63 = vpack.c.bf16 %v673_v49, %v672_v60  ;;  %v648_v3 = vld [vmem:[#allocation4 + $0x70] sm:$0xff]  ;;  %v649_v6 = vld [vmem:[#allocation4 + $0x78] sm:$0xff]  ;;  %v674_v11 = vld [vmem:[#allocation4 + $0x140] sm:$0xff] }
 0x13e   :  { %468 = vadd.xlane.f32.xlu0 %v467_v62  ;;  %v376_v62 = vmul.f32 0.5, %v1768_v54  ;;  %1410 = vmatprep.subr.bf16.mxu1 %v1409_v20  ;;  %v645_v54 = vld [vmem:[#allocation4 + $0x58] sm:$0xff]  ;;  %v1423_v8 = vpack.c.bf16 %v649_v6, %v648_v3  ;;  %v692_v21 = vld [vmem:[#allocation4 + $0x1d0] sm:$0xff]  ;;  %v694_v47 = vld [vmem:[#allocation4 + $0x1e0] sm:$0xff] }
 0x13f   :  { %543 = vadd.xlane.f32.xlu1 %v541_v23  ;;  %1430 = vmatprep.subr.bf16.mxu0 %v1429_v5  ;;  %v1415_v38 = vpack.c.bf16 %v645_v54, %v644_v32  ;;  %v693_v56 = vld [vmem:[#allocation4 + $0x1d8] sm:$0xff]  ;;  %v678_v5 = vld [vmem:[#allocation4 + $0x160] sm:$0xff]  ;;  %v680_v54 = vld [vmem:[#allocation4 + $0x170] sm:$0xff] }
 0x140   :  { %v1445_v52 = vpack.c.bf16 %v693_v56, %v692_v21  ;;  %v681_v33 = vld [vmem:[#allocation4 + $0x178] sm:$0xff] }
 0x141   :  { %1412 = vmatpush3.bf16.msra.mxu1 %v1411_v25 }
 0x142   :  { %503 = vadd.xlane.f32.xlu0 %v502_v29  ;;  %v660_v29 = vld [vmem:[#allocation4 + $0xd0] sm:$0xff] }
 0x143   :  { %577 = vadd.xlane.f32.xlu1 %v575_v27  ;;  %v669_v27 = vld [vmem:[#allocation4 + $0x118] sm:$0xff]  ;;  %v1413_v31 = vpack.c.bf16 %v661_v30, %v660_v29  ;;  %v696_v30 = vld [vmem:[#allocation4 + $0x1f0] sm:$0xff] }
 0x144   :  { %v1545_v9 = vpop.eup %1544  ;;  %v1431_v0 = vpack.c.bf16 %v669_v27, %v668_v26  ;;  %v695_v26 = vld [vmem:[#allocation4 + $0x1e8] sm:$0xff] }
 0x145   :  { %v1547_v39 = vpop.eup %1546  ;;  %v451_v2 = vadd.f32 1.0, %v1545_v9  ;;  %1414 = vmatprep.subr.bf16.mxu1 %v1413_v31  ;;  %v646_v9 = vld [vmem:[#allocation4 + $0x60] sm:$0xff]  ;;  %v1449_v27 = vpack.c.bf16 %v695_v26, %v694_v47  ;;  %v697_v31 = vld [vmem:[#allocation4 + $0x1f8] sm:$0xff] }
 0x146   :  { %478 = vadd.xlane.f32.xlu0 %v477_v41  ;;  %v446_v12 = vadd.f32 1.0, %v1547_v39  ;;  %1432 = vmatpush3.bf16.msra.mxu0 %v1431_v0  ;;  %v671_v41 = vld [vmem:[#allocation4 + $0x128] sm:$0xff]  ;;  %v1453_v32 = vpack.c.bf16 %v697_v31, %v696_v30 }
 0x147   :  { %537 = vadd.xlane.f32.xlu1 %v536_v36  ;;  %v1834_v23 = vmul.f32 %v451_v2, %v381_v13  ;;  %v1435_v44 = vpack.c.bf16 %v671_v41, %v670_v40  ;;  %1416 = vmatpush3.bf16.msra.mxu1 %v1415_v38  ;;  %v663_v36 = vld [vmem:[#allocation4 + $0xe8] sm:$0xff]  ;;  %v1441_v13 = vpack.c.bf16 %v691_v10, %v690_v7 }
 0x148   :  { %v1836_v28 = vmul.f32 %v446_v12, %v376_v62  ;;  %1434 = vmatprep.subr.bf16.mxu0 %v1433_v42  ;;  %v1417_v48 = vpack.c.bf16 %v663_v36, %v662_v46  ;;  %v675_v12 = vld [vmem:[#allocation4 + $0x148] sm:$0xff]  ;;  %v677_v62 = vld [vmem:[#allocation4 + $0x158] sm:$0xff] }
 0x149   :  { %v604_v34 = vsel %vm466_vm1, %v1834_v23, 0.0  ;;  %v610_v37 = vmul.f32 %v1834_v23, %v1834_v23  ;;  %v1443_v14 = vpack.c.bf16 %v675_v12, %v674_v11  ;;  %v679_v0 = vld [vmem:[#allocation4 + $0x168] sm:$0xff] }
 0x14a   :  { %512 = vadd.xlane.f32.xlu0 %v511_v57  ;;  %v609_v45 = vmul.f32 %v1836_v28, %v1836_v28  ;;  %1436 = vmatpush3.bf16.msra.mxu0 %v1435_v44  ;;  %v1419_v57 = vpack.c.bf16 %v647_v50, %v646_v9  ;;  %v1451_v29 = vpack.c.bf16 %v679_v0, %v678_v5  ;;  %v1883_v0 = vld [vmem:[%s1985_s3 + $0xa] ss:$0 sm:$0xff] }
 0x14b   :  { %571 = vadd.xlane.f32.xlu1 %v570_v53  ;;  %v613_v39 = vsel %vm466_vm1, %v610_v37, 0.0  ;;  %1418 = vmatprep.subr.bf16.mxu1 %v1417_v48  ;;  %v664_v53 = vld [vmem:[#allocation4 + $0xf0] sm:$0xff] }
 0x14c   :  { %1420 = vmatpush3.bf16.msra.mxu1 %v1419_v57  ;;  %1438 = vmatprep.subr.bf16.mxu0 %v1437_v61  ;;  %v1421_v2 = vpack.c.bf16 %v665_v1, %v664_v53 }
 0x14e   :  { %580 = vadd.xlane.f32.xlu0 %v579_v16  ;;  %1440 = vmatpush3.bf16.msra.mxu0 %v1439_v63  ;;  %v699_v16 = vld [vmem:[#allocation4 + $0x208] sm:$0xff] }
 0x14f   :  { %546 = vadd.xlane.f32.xlu1 %v545_v22  ;;  %1422 = vmatprep.subr.bf16.mxu1 %v1421_v2  ;;  %v1846_v20 = vpack.c.bf16 %v699_v16, %v698_v15  ;;  %v676_v22 = vld [vmem:[#allocation4 + $0x150] sm:$0xff] }
 0x150   :  { %1424 = vmatpush3.bf16.msra.mxu1 %v1423_v8  ;;  %1442 = vmatprep.subr.bf16.mxu0 %v1441_v13  ;;  %v1447_v25 = vpack.c.bf16 %v677_v62, %v676_v22  ;;  %v1868_v62 = vld [vmem:[%s1985_s3 + $0x9] ss:$0 sm:$0xff] }
 0x151   :  { %1458 = vmatprep.subr.bf16.mxu1 %v1846_v20 }
 0x152   :  { %602 = vadd.xlane.f32.xlu0 %v1836_v28  ;;  %1444 = vmatpush3.bf16.msra.mxu0 %v1443_v14 }
 0x153   :  { %605 = vadd.xlane.f32.xlu1 %v604_v34  ;;  %1446 = vmatprep.subr.bf16.mxu0 %v1445_v52  ;;  %v1455_v34 = vpack.c.bf16 %v681_v33, %v680_v54  ;;  %v700_v33 = vld [vmem:[#allocation4 + $0x210] sm:$0xff] }
 0x156   :  { %611 = vadd.xlane.f32.xlu0 %v609_v45  ;;  %1448 = vmatpush3.bf16.msra.mxu0 %v1447_v25 }
 0x157   :  { %614 = vadd.xlane.f32.xlu1 %v613_v39  ;;  %1450 = vmatprep.subr.bf16.mxu0 %v1449_v27  ;;  %v1878_v27 = vld [vmem:[%s1985_s3 + $0x2] ss:$0 sm:$0xff] }
 0x15a   :  { %1452 = vmatpush3.bf16.msra.mxu0 %v1451_v29 }
 0x15b   :  { %1454 = vmatprep.subr.bf16.mxu0 %v1453_v32 }
 0x15e   :  { %1456 = vmatpush3.bf16.msra.mxu0 %v1455_v34  ;;  %v701_v34 = vld [vmem:[#allocation4 + $0x218] sm:$0xff] }
 0x1bf   :  { %v501_v37 = vpop.xlane.xlu0 %500 }
 0x1c0   :  { %v476_v38 = vpop.xlane.xlu1 %475  ;;  %v505_v4 = vmul.f32 0.0078125, %v501_v37 }
 0x1c1   :  { %v480_v46 = vmul.f32 0.0078125, %v476_v38 }
 0x1c2   :  { %v516_v44 = vmul.f32 %v505_v4, %v505_v4  ;;  %v520_v13 = vsub.f32 %v1773_v58, %v505_v4  ;;  %v1873_v58 = vld [vmem:[%s1985_s3 + $0x1] ss:$0 sm:$0xff] }
 0x1c3   :  { %v465_v40 = vpop.xlane.xlu0 %464 }
 0x1c4   :  { %v471_v41 = vmul.f32 0.0078125, %v465_v40  ;;  %v510_v42 = vpop.xlane.xlu1 %509 }
 0x1c5   :  { %v514_v45 = vmul.f32 0.0078125, %v510_v42 }
 0x1c6   :  { %v482_v36 = vmul.f32 %v471_v41, %v471_v41  ;;  %v486_v52 = vsub.f32 %v1770_v55, %v471_v41 }
 0x1c7   :  { %v518_v48 = vsub.f32 %v514_v45, %v516_v44  ;;  %v569_v9 = vpop.xlane.xlu0 %568 }
 0x1c8   :  { %v484_v50 = vsub.f32 %v480_v46, %v482_v36  ;;  %v535_v51 = vpop.xlane.xlu1 %534  ;;  %v1851_v61 = vmul.f32 0.0078125, %v569_v9  ;;  %v1461_v46 = vpack.c.bf16 %v701_v34, %v700_v33 }
 0x1c9   :  { %v522_v39 = vadd.f32 1e-05, %v518_v48  ;;  %v1849_v57 = vmul.f32 0.0078125, %v535_v51  ;;  %v703_v51 = vld [vmem:[#allocation4 + $0x228] sm:$0xff] }
 0x1ca   :  { %v488_v59 = vadd.f32 1e-05, %v484_v50  ;;  %v584_v7 = vmul.f32 %v1851_v61, %v1851_v61  ;;  %v702_v50 = vld [vmem:[#allocation4 + $0x220] sm:$0xff] }
 0x1cb   :  { %1548 = vrsqrt.f32 %v522_v39  ;;  %v469_v60 = vpop.xlane.xlu0 %468  ;;  %v550_v63 = vmul.f32 %v1849_v57, %v1849_v57 }
 0x1cc   :  { %1550 = vrsqrt.f32 %v488_v59  ;;  %v544_v49 = vpop.xlane.xlu1 %543  ;;  %v1855_v3 = vmul.f32 0.0078125, %v469_v60  ;;  %v554_v59 = vsub.f32 %v1793_v18, %v1849_v57  ;;  %v588_v18 = vsub.f32 %v1791_v17, %v1851_v61  ;;  %v567_v17 = vld [vmem:[%s1985_s3 + $0x1a] ss:$0 sm:$0xff] }
 0x1cd   :  { %v548_v53 = vmul.f32 0.0078125, %v544_v49 }
 0x1ce   :  { %v483_v14 = vmul.f32 %v1855_v3, %v1855_v3 }
 0x1cf   :  { %v552_v1 = vsub.f32 %v548_v53, %v550_v63  ;;  %v504_v2 = vpop.xlane.xlu0 %503 }
 0x1d0   :  { %v578_v6 = vpop.xlane.xlu1 %577  ;;  %v1862_v15 = vmul.f32 0.0078125, %v504_v2  ;;  %v1465_v2 = vpack.c.bf16 %v703_v51, %v702_v50 }
 0x1d1   :  { %v556_v8 = vadd.f32 1e-05, %v552_v1  ;;  %v582_v10 = vmul.f32 0.0078125, %v578_v6  ;;  %v1905_v6 = vld [vmem:[%s1985_s3 + $0x11] ss:$0 sm:$0xff] }
 0x1d2   :  { %v517_v29 = vmul.f32 %v1862_v15, %v1862_v15 }
 0x1d3   :  { %1552 = vrsqrt.f32 %v556_v8  ;;  %v586_v11 = vsub.f32 %v582_v10, %v584_v7  ;;  %v479_v12 = vpop.xlane.xlu0 %478 }
 0x1d4   :  { %v481_v16 = vmul.f32 0.0078125, %v479_v12  ;;  %v538_v21 = vpop.xlane.xlu1 %537  ;;  %v705_v12 = vld [vmem:[#allocation4 + $0x238] sm:$0xff] }
 0x1d5   :  { %v1549_v56 = vpop.eup %1548  ;;  %v590_v22 = vadd.f32 1e-05, %v586_v11  ;;  %v1889_v38 = vmul.f32 0.0078125, %v538_v21  ;;  %v704_v11 = vld [vmem:[#allocation4 + $0x230] sm:$0xff] }
 0x1d6   :  { %v1551_v25 = vpop.eup %1550  ;;  %v485_v47 = vsub.f32 %v481_v16, %v483_v14  ;;  %v526_v26 = vmul.f32 %v1549_v56, %v520_v13  ;;  %v566_v16 = vld [vmem:[%s1985_s3 + $0x19] ss:$0 sm:$0xff]  ;;  %v1469_v61 = vpack.c.bf16 %v705_v12, %v704_v11  ;;  %v601_v12 = vld [vmem:[%s1985_s3 + $0x22] ss:$0 sm:$0xff] }
 0x1d7   :  { %v492_v55 = vmul.f32 %v1551_v25, %v486_v52  ;;  %1554 = vrsqrt.f32 %v590_v22  ;;  %v513_v5 = vpop.xlane.xlu0 %512  ;;  %v551_v60 = vmul.f32 %v1889_v38, %v1889_v38  ;;  %v487_v25 = vsub.f32 %v1795_v19, %v1855_v3 }
 0x1d8   :  { %v489_v30 = vadd.f32 1e-05, %v485_v47  ;;  %v515_v31 = vmul.f32 0.0078125, %v513_v5  ;;  %v572_v32 = vpop.xlane.xlu1 %571  ;;  %v528_v54 = vmul.f32 %v526_v26, %v1868_v62  ;;  %v521_v3 = vsub.f32 %v1804_v24, %v1862_v15 }
 0x1d9   :  { %v494_v37 = vmul.f32 %v492_v55, %v1873_v58  ;;  %v1891_v4 = vmul.f32 0.0078125, %v572_v32 }
 0x1da   :  { %1556 = vrsqrt.f32 %v489_v30  ;;  %v519_v40 = vsub.f32 %v515_v31, %v517_v29  ;;  %v530_v41 = vadd.f32 %v528_v54, %v1883_v0  ;;  %v533_v29 = vld [vmem:[%s1985_s3 + $0x12] ss:$0 sm:$0xff]  ;;  %v706_v30 = vld [vmem:[#allocation4 + $0x240] sm:$0xff]  ;;  %v707_v31 = vld [vmem:[#allocation4 + $0x248] sm:$0xff] }
 0x1db   :  { %v496_v42 = vadd.f32 %v494_v37, %v1878_v27  ;;  %v585_v44 = vmul.f32 %v1891_v4, %v1891_v4  ;;  %v581_v45 = vpop.xlane.xlu0 %580  ;;  %v589_v50 = vsub.f32 %v1819_v43, %v1891_v4 }
 0x1dc   :  { %v523_v36 = vadd.f32 1e-05, %v519_v40  ;;  %v583_v48 = vmul.f32 0.0078125, %v581_v45  ;;  %779 = vmatprep.mubr.f32.mxu1 %v530_v41  ;;  %v547_v9 = vpop.xlane.xlu1 %546  ;;  %v1473_v41 = vpack.c.bf16 %v707_v31, %v706_v30  ;;  %v708_v45 = vld [vmem:[#allocation4 + $0x250] sm:$0xff] }
 0x1dd   :  { %v1553_v39 = vpop.eup %1552  ;;  %v549_v49 = vmul.f32 0.0078125, %v547_v9  ;;  %780 = vmatmul.mubr.f32.vlgmr.msra.gmra.mrb[4].mxu1 %v496_v42 }
 0x1de   :  { %1558 = vrsqrt.f32 %v523_v36  ;;  %v587_v63 = vsub.f32 %v583_v48, %v585_v44  ;;  %1460 = vmatpush3.bf16.msra.mxu1 %v1846_v20  ;;  %v560_v7 = vmul.f32 %v1553_v39, %v554_v59  ;;  %v555_v39 = vsub.f32 %v1813_v35, %v1889_v38  ;;  %v710_v59 = vld [vmem:[#allocation4 + $0x260] sm:$0xff] }
 0x1df   :  { %v553_v53 = vsub.f32 %v549_v49, %v551_v60  ;;  %v603_v1 = vpop.xlane.xlu0 %602  ;;  %1462 = vmatprep.subr.bf16.mxu1 %v1461_v46  ;;  %v711_v60 = vld [vmem:[#allocation4 + $0x268] sm:$0xff] }
 0x1e0   :  { %v591_v57 = vadd.f32 1e-05, %v587_v63  ;;  %v1909_v8 = vmul.f32 0.0078125, %v603_v1  ;;  %v606_v10 = vpop.xlane.xlu1 %605  ;;  %v562_v52 = vmul.f32 %v560_v7, %v1905_v6  ;;  %v1481_v4 = vpack.c.bf16 %v711_v60, %v710_v59  ;;  %v713_v7 = vld [vmem:[#allocation4 + $0x278] sm:$0xff] }
 0x1e1   :  { %v1555_v20 = vpop.eup %1554  ;;  %v557_v13 = vadd.f32 1e-05, %v553_v53  ;;  %v1911_v14 = vmul.f32 0.0078125, %v606_v10 }
 0x1e2   :  { %1560 = vrsqrt.f32 %v591_v57  ;;  %1464 = vmatpush3.bf16.msra.mxu1 %v1461_v46  ;;  %v594_v21 = vmul.f32 %v1555_v20, %v588_v18  ;;  %v618_v47 = vmul.f32 %v1909_v8, %v1909_v8  ;;  %v564_v40 = vadd.f32 %v562_v52, %v533_v29  ;;  %v709_v46 = vld [vmem:[#allocation4 + $0x258] sm:$0xff]  ;;  %v714_v52 = vld [vmem:[%s1985_s3 + $0x3] ss:$0 sm:$0xff] }
 0x1e3   :  { %1562 = vrsqrt.f32 %v557_v13  ;;  %v612_v56 = vpop.xlane.xlu0 %611  ;;  %1466 = vmatprep.subr.bf16.mxu1 %v1465_v2  ;;  %v619_v32 = vmul.f32 %v1911_v14, %v1911_v14  ;;  %v1477_v15 = vpack.c.bf16 %v709_v46, %v708_v45  ;;  %v623_v57 = vsub.f32 %v1834_v23, %v1911_v14  ;;  %v992_v23 = vld [vmem:[#allocation4 + $0x280] sm:$0xff]  ;;  %v993_v14 = vld [vmem:[#allocation4 + $0x288] sm:$0xff] }
 0x1e4   :  { %v1557_v22 = vpop.eup %1556  ;;  %v616_v26 = vmul.f32 0.0078125, %v612_v56  ;;  %v615_v55 = vpop.xlane.xlu1 %614  ;;  %v596_v5 = vmul.f32 %v594_v21, %v566_v16  ;;  %v1489_v21 = vpack.c.bf16 %v993_v14, %v992_v23  ;;  %v1006_v23 = vld [vmem:[#allocation4 + $0x2f0] sm:$0xff]  ;;  %v1007_v14 = vld [vmem:[#allocation4 + $0x2f8] sm:$0xff] }
 0x1e5   :  { %v617_v54 = vmul.f32 0.0078125, %v615_v55  ;;  %v493_v19 = vmul.f32 %v1557_v22, %v487_v25 }
 0x1e6   :  { %v620_v33 = vsub.f32 %v616_v26, %v618_v47  ;;  %1468 = vmatpush3.bf16.msra.mxu1 %v1465_v2  ;;  %v598_v34 = vadd.f32 %v596_v5, %v567_v17  ;;  %v712_v2 = vld [vmem:[#allocation4 + $0x270] sm:$0xff]  ;;  %1490 = vmatprep.subr.bf16.mxu0 %v1489_v21 }
 0x1e7   :  { %v621_v37 = vsub.f32 %v617_v54, %v619_v32  ;;  %1470 = vmatprep.subr.bf16.mxu1 %v1469_v61  ;;  %v495_v9 = vmul.f32 %v493_v19, %v1873_v58  ;;  %v1485_v18 = vpack.c.bf16 %v713_v7, %v712_v2  ;;  %v995_v2 = vld [vmem:[#allocation4 + $0x298] sm:$0xff] }
 0x1e8   :  { %v1559_v42 = vpop.eup %1558  ;;  %v624_v44 = vadd.f32 1e-05, %v620_v33  ;;  %854 = vmatprep.mubr.f32.mxu0 %v598_v34 }
 0x1e9   :  { %v625_v36 = vadd.f32 1e-05, %v621_v37  ;;  %855 = vmatmul.mubr.f32.vlgmr.msra.gmra.mrb[6].mxu0 %v564_v40  ;;  %v527_v48 = vmul.f32 %v1559_v42, %v521_v3  ;;  %v497_v58 = vadd.f32 %v495_v9, %v1878_v27 }
 0x1ea   :  { %1564 = vrsqrt.f32 %v624_v44  ;;  %1472 = vmatpush3.bf16.msra.mxu1 %v1469_v61  ;;  %1492 = vmatpush3.bf16.msra.mxu0 %v1489_v21  ;;  %v1517_v21 = vpack.c.bf16 %v1007_v14, %v1006_v23 }
 0x1eb   :  { %1566 = vrsqrt.f32 %v625_v36  ;;  %1474 = vmatprep.subr.bf16.mxu1 %v1473_v41  ;;  %v529_v24 = vmul.f32 %v527_v48, %v1868_v62 }
 0x1ec   :  { %v1561_v51 = vpop.eup %1560 }
 0x1ed   :  { %v1563_v49 = vpop.eup %1562  ;;  %v531_v63 = vadd.f32 %v529_v24, %v1883_v0  ;;  %v595_v53 = vmul.f32 %v1561_v51, %v589_v50  ;;  %v622_v0 = vsub.f32 %v1836_v28, %v1909_v8 }
 0x1ee   :  { %1476 = vmatpush3.bf16.msra.mxu1 %v1473_v41  ;;  %v561_v1 = vmul.f32 %v1563_v49, %v555_v39 }
 0x1ef   :  { %784 = vmatprep.mubr.f32.mxu1 %v531_v63  ;;  %1478 = vmatprep.subr.bf16.mxu1 %v1477_v15  ;;  %v597_v43 = vmul.f32 %v595_v53, %v566_v16 }
 0x1f0   :  { %785 = vmatmul.mubr.f32.gmra.mrb[6].mxu1 %v497_v58  ;;  %v563_v62 = vmul.f32 %v561_v1, %v1905_v6  ;;  %v600_v6 = vld [vmem:[%s1985_s3 + $0x21] ss:$0 sm:$0xff] }
 0x1f1   :  { %v599_v35 = vadd.f32 %v597_v43, %v567_v17 }
 0x1f2   :  { %1480 = vmatpush3.bf16.msra.mxu1 %v1477_v15  ;;  %v565_v38 = vadd.f32 %v563_v62, %v533_v29  ;;  %v994_v62 = vld [vmem:[#allocation4 + $0x290] sm:$0xff] }
 0x1f3   :  { %859 = vmatprep.mubr.f32.mxu0 %v599_v35  ;;  %1482 = vmatprep.subr.bf16.mxu1 %v1481_v4  ;;  %v1493_v7 = vpack.c.bf16 %v995_v2, %v994_v62  ;;  %v996_v35 = vld [vmem:[#allocation4 + $0x2a0] sm:$0xff] }
 0x1f4   :  { %v1565_v27 = vpop.eup %1564  ;;  %860 = vmatmul.mubr.f32.gmra.mrb[8].mxu0 %v565_v38  ;;  %v997_v38 = vld [vmem:[#allocation4 + $0x2a8] sm:$0xff] }
 0x1f5   :  { %v1567_v10 = vpop.eup %1566  ;;  %v628_v11 = vmul.f32 %v1565_v27, %v622_v0  ;;  %1494 = vmatprep.subr.bf16.mxu0 %v1493_v7  ;;  %v1497_v0 = vpack.c.bf16 %v997_v38, %v996_v35  ;;  %v999_v27 = vld [vmem:[#allocation4 + $0x2b8] sm:$0xff] }
 0x1f6   :  { %1484 = vmatpush3.bf16.msra.mxu1 %v1481_v4  ;;  %v629_v28 = vmul.f32 %v1567_v10, %v623_v57  ;;  %1496 = vmatpush3.bf16.msra.mxu0 %v1493_v7  ;;  %v1001_v10 = vld [vmem:[#allocation4 + $0x2c8] sm:$0xff] }
 0x1f7   :  { %1486 = vmatprep.subr.bf16.mxu1 %v1485_v18  ;;  %v630_v8 = vmul.f32 %v628_v11, %v600_v6  ;;  %1498 = vmatprep.subr.bf16.mxu0 %v1497_v0  ;;  %v1002_v11 = vld [vmem:[#allocation4 + $0x2d0] sm:$0xff] }
 0x1f8   :  { %v631_v20 = vmul.f32 %v629_v28, %v600_v6  ;;  %v1000_v6 = vld [vmem:[#allocation4 + $0x2c0] sm:$0xff]  ;;  %v1003_v28 = vld [vmem:[#allocation4 + $0x2d8] sm:$0xff] }
 0x1f9   :  { %v632_v13 = vadd.f32 %v630_v8, %v601_v12  ;;  %v1509_v8 = vpack.c.bf16 %v1003_v28, %v1002_v11 }
 0x1fa   :  { %1488 = vmatpush3.bf16.msra.mxu1 %v1485_v18  ;;  %v633_v16 = vadd.f32 %v631_v20, %v601_v12  ;;  %1500 = vmatpush3.bf16.msra.mxu0 %v1497_v0  ;;  %v998_v18 = vld [vmem:[#allocation4 + $0x2b0] sm:$0xff]  ;;  %v1505_v12 = vpack.c.bf16 %v1001_v10, %v1000_v6  ;;  %v1004_v20 = vld [vmem:[#allocation4 + $0x2e0] sm:$0xff] }
 0x1fb   :  { %1283 = vmatprep.mubr.f32.mxu1 %v632_v13  ;;  %v1501_v57 = vpack.c.bf16 %v999_v27, %v998_v18  ;;  %v1005_v13 = vld [vmem:[#allocation4 + $0x2e8] sm:$0xff] }
 0x1fd   :  { %1284 = vmatmul.mubr.f32.vlgmr.msra.gmra.mrb[8].mxu1 %v633_v16  ;;  %1502 = vmatprep.subr.bf16.mxu0 %v1501_v57  ;;  %v1513_v16 = vpack.c.bf16 %v1005_v13, %v1004_v20 }
 0x1fe   :  { %1504 = vmatpush3.bf16.msra.mxu0 %v1501_v57 }
 0x1ff   :  { %1506 = vmatprep.subr.bf16.mxu0 %v1505_v12 }
 0x202   :  { %1508 = vmatpush3.bf16.msra.mxu0 %v1505_v12 }
 0x203   :  { %1510 = vmatprep.subr.bf16.mxu0 %v1509_v8 }
 0x206   :  { %1512 = vmatpush3.bf16.msra.mxu0 %v1509_v8 }
 0x207   :  { %1514 = vmatprep.subr.bf16.mxu0 %v1513_v16 }
 0x20a   :  { %1516 = vmatpush3.bf16.msra.mxu0 %v1513_v16 }
 0x20b   :  { %1518 = vmatprep.subr.bf16.mxu0 %v1517_v21 }
 0x20e   :  { %1520 = vmatpush3.bf16.msra.mxu0 %v1517_v21 }
 0x2b0   :  { %v1144_v56 = vpop.f32.mrb[4].mxu1 }
 0x2b1   :  { %v1145_v17 = vpop.f32.mrb[5].mxu1 }
 0x2b2   :  { %v1146_v61 = vadd.f32 %v1145_v17, %v1144_v56 }
 0x2b4   :  { %v782_v47 = vadd.f32 %v1146_v61, %v714_v52 }
 0x2bc   :  { %v1182_v22 = vpop.f32.mrb[6].mxu0 }
 0x2bd   :  { %v1183_v25 = vpop.f32.mrb[7].mxu0 }
 0x2be   :  { %v1184_v26 = vadd.f32 %v1183_v25, %v1182_v22 }
 0x2c0   :  { %v857_v55 = vadd.f32 %v1184_v26, %v782_v47 }
 0x2c3   :  { %v1147_v5 = vpop.f32.mrb[6].mxu1 }
 0x2c4   :  { %v1148_v29 = vpop.f32.mrb[7].mxu1 }
 0x2c5   :  { %v1149_v30 = vadd.f32 %v1148_v29, %v1147_v5 }
 0x2c7   :  { %v1185_v31 = vpop.f32.mrb[8].mxu0  ;;  %v787_v54 = vadd.f32 %v1149_v30, %v714_v52 }
 0x2c8   :  { %v1186_v32 = vpop.f32.mrb[9].mxu0 }
 0x2c9   :  { %v1187_v33 = vadd.f32 %v1186_v32, %v1185_v31 }
 0x2cb   :  { %v862_v34 = vadd.f32 %v1187_v33, %v787_v54 }
 0x2d0   :  { %v1285_v19 = vpop.f32.mrb[8].mxu1 }
 0x2d1   :  { %v937_v3 = vadd.f32 %v1285_v19, %v862_v34  ;;  %v931_v37 = vpop.f32.mrb[9].mxu1  ;;  %v958_v19 = vld [vmem:[%s1985_s3 + $0x4] ss:$0 sm:$0xff] }
 0x2d2   :  { %v932_v40 = vadd.f32 %v931_v37, %v857_v55 }
 0x2d3   :  { %v943_v41 = vmul.f32 0.044715, %v937_v3  ;;  %v941_v39 = vmul.f32 0.5, %v937_v3 }
 0x2d4   :  { %v942_v42 = vmul.f32 0.044715, %v932_v40  ;;  %v940_v60 = vmul.f32 0.5, %v932_v40 }
 0x2d5   :  { %v945_v44 = vmul.f32 %v943_v41, %v937_v3 }
 0x2d6   :  { %v944_v45 = vmul.f32 %v942_v42, %v932_v40 }
 0x2d7   :  { %v947_v46 = vmul.f32 %v945_v44, %v937_v3 }
 0x2d8   :  { %v946_v36 = vmul.f32 %v944_v45, %v932_v40 }
 0x2d9   :  { %v949_v48 = vadd.f32 %v947_v46, %v937_v3 }
 0x2da   :  { %v948_v9 = vadd.f32 %v946_v36, %v932_v40  ;;  %v959_v40 = vld [vmem:[%s1985_s3 + $0x5] ss:$0 sm:$0xff]  ;;  %v1008_v36 = vld [vmem:[%s1985_s3 + $0x6] ss:$0 sm:$0xff] }
 0x2db   :  { %v951_v50 = vmul.f32 0.7978846, %v949_v48 }
 0x2dc   :  { %v950_v24 = vmul.f32 0.7978846, %v948_v9 }
 0x2dd   :  { %1568 = vtanh.f32 %v951_v50 }
 0x2de   :  { %1570 = vtanh.f32 %v950_v24 }
 0x2e7   :  { %v1569_v15 = vpop.eup %1568 }
 0x2e8   :  { %v1571_v51 = vpop.eup %1570  ;;  %v955_v59 = vadd.f32 1.0, %v1569_v15 }
 0x2e9   :  { %v954_v49 = vadd.f32 1.0, %v1571_v51 }
 0x2ea   :  { %v1953_v63 = vmul.f32 %v955_v59, %v941_v39 }
 0x2eb   :  { %v1955_v53 = vmul.f32 %v954_v49, %v940_v60 }
 0x2ec   :  { %v962_v58 = vsel %vm466_vm1, %v1953_v63, 0.0  ;;  %v968_v1 = vmul.f32 %v1953_v63, %v1953_v63 }
 0x2ed   :  { %963 = vadd.xlane.f32.xlu1 %v962_v58  ;;  %960 = vadd.xlane.f32.xlu0 %v1955_v53  ;;  %v967_v43 = vmul.f32 %v1955_v53, %v1955_v53 }
 0x2ee   :  { %v971_v4 = vsel %vm466_vm1, %v968_v1, 0.0 }
 0x2f1   :  { %972 = vadd.xlane.f32.xlu1 %v971_v4  ;;  %969 = vadd.xlane.f32.xlu0 %v967_v43 }
 0x37a   :  { %v964_v56 = vpop.xlane.xlu1 %963  ;;  %v961_v17 = vpop.xlane.xlu0 %960 }
 0x37b   :  { %v966_v61 = vmul.f32 0.0078125, %v964_v56  ;;  %v965_v52 = vmul.f32 0.0078125, %v961_v17 }
 0x37d   :  { %v977_v47 = vmul.f32 %v966_v61, %v966_v61  ;;  %v976_v26 = vmul.f32 %v965_v52, %v965_v52  ;;  %v981_v54 = vsub.f32 %v1953_v63, %v966_v61  ;;  %v980_v34 = vsub.f32 %v1955_v53, %v965_v52 }
 0x37e   :  { %v973_v22 = vpop.xlane.xlu1 %972  ;;  %v970_v25 = vpop.xlane.xlu0 %969 }
 0x37f   :  { %v975_v55 = vmul.f32 0.0078125, %v973_v22  ;;  %v974_v5 = vmul.f32 0.0078125, %v970_v25 }
 0x381   :  { %v979_v29 = vsub.f32 %v975_v55, %v977_v47  ;;  %v978_v30 = vsub.f32 %v974_v5, %v976_v26 }
 0x383   :  { %v983_v31 = vadd.f32 1e-05, %v979_v29  ;;  %v982_v32 = vadd.f32 1e-05, %v978_v30 }
 0x385   :  { %1572 = vrsqrt.f32 %v983_v31 }
 0x386   :  { %1574 = vrsqrt.f32 %v982_v32 }
 0x38f   :  { %v1573_v33 = vpop.eup %1572 }
 0x390   :  { %v1575_v3 = vpop.eup %1574  ;;  %v987_v37 = vmul.f32 %v1573_v33, %v981_v54 }
 0x391   :  { %v986_v41 = vmul.f32 %v1575_v3, %v980_v34 }
 0x392   :  { %v989_v42 = vmul.f32 %v987_v37, %v958_v19 }
 0x393   :  { %v988_v44 = vmul.f32 %v986_v41, %v958_v19 }
 0x394   :  { %v991_v45 = vadd.f32 %v989_v42, %v959_v40 }
 0x395   :  { %v990_v46 = vadd.f32 %v988_v44, %v959_v40 }
 0x397   :  { %1318 = vmatprep.mubr.f32.mxu0 %v990_v46 }
 0x398   :  { %1319 = vmatmul.mubr.f32.vlgmr.msra.gmra.mrb[10].mxu0 %v991_v45 }
 0x46b   :  { %v1320_v48 = vpop.f32.mrb[10].mxu0 }
 0x46c   :  { %v1081_v9 = vadd.f32 %v1320_v48, %v1008_v36  ;;  %v1075_v50 = vpop.f32.mrb[11].mxu0 }
 0x46d   :  { %v1076_v24 = vadd.f32 %v1075_v50, %v1008_v36 }
 0x46e   :  { %1085 = vst [vmem:[%s1986_s4 + $0x8] sm:$0x3f] %v1081_v9 }
 0x46f   :  { %1084 = vst [vmem:[%s1986_s4] sm:$0xff] %v1076_v24 }
 0x470   :  { %1090 = vsyncpa [#allocation3], 1 }
 0x471   :  { %1091 = vsyncpa [#allocation5], 1 }

</bundles_post_ra>
